<compile_context>
chip_gen: v5e
topology: v5e:2x2
jax: 0.10.0
libtpu: 0.0.40
codegen_flags: <defaults>
</compile_context>

<pallas_src>
import functools

import jax
import jax.numpy as jnp
from jax.experimental import pallas as pl
from jax.experimental.pallas import tpu as pltpu

_LANE = 128
_SMALL_BATCH_ROWS = 64  # below this, skip the pallas_call and use plain XLA


def _round_up(x, m):
    return ((x + m - 1) // m) * m


def _cdiv(a, b):
    return -(-a // b)


# ----------------------------------------------------------------------------
# Kernel
# ----------------------------------------------------------------------------
def _mlp_kernel(*refs, n_layers, residual_flags, compute_dtype):
    """Fused MLP: every Linear (+ReLU, +residual) layer in one kernel body.

    refs = (x_ref, w0, b0, w1, b1, ..., o_ref).  Intermediate activations never
    leave vregs/VMEM; only the final layer's output is written back to HBM.
    Weights arrive already in compute_dtype; bias add and accumulation are f32.
    """
    x_ref = refs[0]
    o_ref = refs[-1]
    params = refs[1:-1]

    x = x_ref[...]
    act = x if x.dtype == compute_dtype else x.astype(compute_dtype)
    prev = x  # residual source for layer 0 (input dtype, f32 here)
    h = act
    for i in range(n_layers):
        w = params[2 * i][...]        # (din_pad, dout_pad), compute_dtype
        b = params[2 * i + 1][...]    # (1, dout_pad), f32
        h = jnp.dot(act, w, preferred_element_type=jnp.float32) + b
        if i < n_layers - 1:
            h = jnp.maximum(h, 0.0)   # ReLU on every layer but the last
        if residual_flags[i]:
            h = h + prev              # shortcut (shapes match by construction)
        prev = h                      # f32
        if i < n_layers - 1:
            act = h if compute_dtype == jnp.float32 else h.astype(compute_dtype)
    o_ref[...] = h.astype(o_ref.dtype)


# ----------------------------------------------------------------------------
# VMEM budgeting
# ----------------------------------------------------------------------------
def _vmem_cap_bytes():
    # ~75% of physical VMEM: ~48 MiB on v7x (64 MiB parts), ~96 MiB on
    # v5e/v6e (128 MiB parts).  Conservative fallback if the query fails.
    try:
        cap = int(pltpu.get_tpu_info().vmem_capacity_bytes)
    except Exception:
        cap = 64 * 1024 * 1024
    return (cap * 3) // 4


def _vmem_budget_bytes(tm, dims_pad, param_bytes, io_itemsize, single_buffer_params):
    # Pipelined (double-buffered) input + output row tiles ...
    io = 2 * tm * (dims_pad[0] + dims_pad[-1]) * io_itemsize
    # ... f32 intermediates held across layers within one grid step ...
    inter = sum(tm * d * 4 for d in dims_pad[1:])
    # ... resident parameter stack (1x if single-buffered, else 2x).
    params = param_bytes if single_buffer_params else 2 * param_bytes
    est = io + inter + params
    est = est + est // 2 + (2 << 20)  # 1.5x + fixed headroom for compiler scratch
    return int(min(max(est, 8 << 20), _vmem_cap_bytes()))


# ----------------------------------------------------------------------------
# Wrapper
# ----------------------------------------------------------------------------
def mlp_forward_pallas(x, weights_pad, biases_pad, residual_flags, *, out_dim,
                       compute_dtype=jnp.bfloat16, row_tile=1024):
    m, in_dim = x.shape
    din_pad = weights_pad[0].shape[0]
    dout_pad = weights_pad[-1].shape[1]
    dims_pad = [din_pad] + [w.shape[1] for w in weights_pad]

    # Waste-minimizing row tile: split m into cdiv(m, row_tile) near-equal tiles.
    row_align = 8 if compute_dtype == jnp.float32 else 16
    num_tiles = max(1, _cdiv(m, row_tile))
    tm = _round_up(_cdiv(m, num_tiles), row_align)
    m_pad = _round_up(m, tm)

    x_p = x
    if m_pad != m or din_pad != in_dim:
        x_p = jnp.pad(x, ((0, m_pad - m), (0, din_pad - in_dim)))

    grid = (m_pad // tm,)

    params = []
    for w, b in zip(weights_pad, biases_pad):
        params.extend((w, b))
    param_bytes = sum(int(p.size) * p.dtype.itemsize for p in params)

    kernel = functools.partial(
        _mlp_kernel,
        n_layers=len(weights_pad),
        residual_flags=tuple(bool(r) for r in residual_flags),
        compute_dtype=compute_dtype,
    )

    def build(single_buffer_params):
        in_specs = [pl.BlockSpec((tm, din_pad), lambda i: (i, 0))]
        for w, b in zip(weights_pad, biases_pad):
            din, dout = w.shape
            # Weights/biases: same (0, 0) block every grid step -> resident in
            # VMEM across all row tiles; single-buffer them (no pipelining gain).
            kw = {"pipeline_mode": pl.Buffered(1)} if single_buffer_params else {}
            in_specs.append(pl.BlockSpec((din, dout), lambda i: (0, 0), **kw))
            in_specs.append(pl.BlockSpec((1, dout), lambda i: (0, 0), **kw))
        vmem = _vmem_budget_bytes(tm, dims_pad, param_bytes,
                                  x.dtype.itemsize, single_buffer_params)
        return pl.pallas_call(
            kernel,
            out_shape=jax.ShapeDtypeStruct((m_pad, dout_pad), x.dtype),
            grid=grid,
            in_specs=in_specs,
            out_specs=pl.BlockSpec((tm, dout_pad), lambda i: (i, 0)),
            compiler_params=pltpu.CompilerParams(
                dimension_semantics=("parallel",),
                vmem_limit_bytes=vmem,
            ),
        )

    try:
        out = build(True)(x_p, *params)
    except Exception:
        # pl.Buffered(1) not supported by this JAX build -> default buffering.
        out = build(False)(x_p, *params)

    if m_pad != m or dout_pad != out_dim:
        out = out[:m, :out_dim]
    return out


def _jnp_forward(x, weights, biases, residual_flags):
    """Plain XLA forward on the unpadded weights (f32 math). Also the reference."""
    prev = x
    h = x
    n = len(weights)
    for i in range(n):
        h = prev @ weights[i].astype(jnp.float32) + biases[i].astype(jnp.float32)
        if i < n - 1:
            h = jnp.maximum(h, 0.0)
        if residual_flags[i]:
            h = h + prev
        prev = h
    return h


class MultiLayerPerceptronPallas:
    """JAX/Pallas port of benchmol's MultiLayerPerceptron (forward only).

    # TODO(synk): batch_norm (BatchNorm1d) and dropout branches are not
    # implemented (module defaults disable both).
    """

    def __init__(self, input_dim, hidden_dims, short_cut=False, key=None,
                 compute_dtype=jnp.bfloat16, row_tile=1024):
        if isinstance(hidden_dims, int):
            hidden_dims = [hidden_dims]
        self.dims = [input_dim] + list(hidden_dims)
        self.dims_pad = [_round_up(d, _LANE) for d in self.dims]
        self.short_cut = short_cut
        self.compute_dtype = compute_dtype
        self.row_tile = row_tile
        if key is None:
            key = jax.random.PRNGKey(0)

        self.weights = []       # raw (in, out) in compute_dtype   -> reference / fallback
        self.biases = []        # raw (out,) f32
        self.weights_pad = []   # zero-padded to 128 multiples     -> kernel
        self.biases_pad = []    # (1, out_pad) f32
        self.residual_flags = []
        for i in range(len(self.dims) - 1):
            fan_in, fan_out = self.dims[i], self.dims[i + 1]
            key, kw, kb = jax.random.split(key, 3)
            bound = 1.0 / (fan_in ** 0.5)  # PyTorch nn.Linear default init
            w = jax.random.uniform(kw, (fan_in, fan_out), jnp.float32,
                                   minval=-bound, maxval=bound).astype(compute_dtype)
            b = jax.random.uniform(kb, (fan_out,), jnp.float32,
                                   minval=-bound, maxval=bound)
            self.weights.append(w)
            self.biases.append(b)

            fi_p, fo_p = self.dims_pad[i], self.dims_pad[i + 1]
            w_p = jnp.zeros((fi_p, fo_p), compute_dtype).at[:fan_in, :fan_out].set(w)
            b_p = jnp.zeros((1, fo_p), jnp.float32).at[0, :fan_out].set(b)
            self.weights_pad.append(w_p)
            self.biases_pad.append(b_p)
            # Residual eligibility decided on the ORIGINAL dims (PyTorch shape check).
            self.residual_flags.append(bool(short_cut and fan_in == fan_out))

    def __call__(self, x):
        if x.shape[0] < _SMALL_BATCH_ROWS:
            # Tiny batches: pallas launch + DMA setup dwarfs the work.
            return _jnp_forward(x, self.weights, self.biases, self.residual_flags)
        return mlp_forward_pallas(
            x, self.weights_pad, self.biases_pad, self.residual_flags,
            out_dim=self.dims[-1],
            compute_dtype=self.compute_dtype,
            row_tile=self.row_tile,
        )


def _reference_forward(mlp, x):
    return _jnp_forward(x, mlp.weights, mlp.biases, mlp.residual_flags)


if __name__ == "__main__":
    key = jax.random.PRNGKey(0)
    k_x, k1, k2, k3 = jax.random.split(key, 4)

    batch = 200          # e.g. number of graph nodes (not a tile multiple on purpose)
    input_dim = 32
    hidden_dims = [64, 32, 16]

    x = jax.random.normal(k_x, (batch, input_dim), jnp.float32)

    # 1) f32 compute path: bit-tight check against the pure-JAX reference.
    mlp = MultiLayerPerceptronPallas(input_dim, hidden_dims, short_cut=False,
                                     key=k1, compute_dtype=jnp.float32)
    out = jax.block_until_ready(mlp(x))
    ref = _reference_forward(mlp, x)
    assert out.shape == (batch, hidden_dims[-1])
    assert jnp.allclose(out, ref, atol=1e-5, rtol=1e-5)

    # 2) Residual (short_cut) path with matching dims, f32.
    mlp2 = MultiLayerPerceptronPallas(32, [32, 32], short_cut=True,
                                      key=k2, compute_dtype=jnp.float32)
    out2 = jax.block_until_ready(mlp2(x))
    ref2 = _reference_forward(mlp2, x)
    assert jnp.allclose(out2, ref2, atol=1e-5, rtol=1e-5)

    # 3) Default bf16 compute path (MXU bf16 operands, f32 accumulation):
    #    compared with loose tolerance against the f32 reference (expected
    #    bf16 operand rounding).
    mlp3 = MultiLayerPerceptronPallas(input_dim, hidden_dims, short_cut=False, key=k3)
    out3 = jax.block_until_ready(mlp3(x))
    ref3 = _reference_forward(mlp3, x)
    assert jnp.allclose(out3, ref3, atol=6e-2, rtol=6e-2)

    # 4) Small-batch XLA fallback path.
    xs = x[:8]
    out4 = jax.block_until_ready(mlp(xs))
    ref4 = _reference_forward(mlp, xs)
    assert jnp.allclose(out4, ref4, atol=1e-5, rtol=1e-5)

    print("KERNEL_OK")
</pallas_src>

<mosaic_0001>
module attributes {stable_mosaic.version = 11 : i64} {
  func.func @_mlp_kernel(%arg0: i32, %arg1: memref<200x128xf32, #tpu.memory_space<vmem>>, %arg2: memref<128x128xf32, #tpu.memory_space<vmem>>, %arg3: memref<1x128xf32, #tpu.memory_space<vmem>>, %arg4: memref<128x128xf32, #tpu.memory_space<vmem>>, %arg5: memref<1x128xf32, #tpu.memory_space<vmem>>, %arg6: memref<128x128xf32, #tpu.memory_space<vmem>>, %arg7: memref<1x128xf32, #tpu.memory_space<vmem>>, %arg8: memref<200x128xf32, #tpu.memory_space<vmem>>) attributes {dimension_semantics = [#tpu.dimension_semantics<parallel>], iteration_bounds = array<i64: 1>, scalar_prefetch = 0 : i64, scratch_operands = 0 : i64, tpu.core_type = #tpu.core_type<tc>, window_params = [{transform_indices = @transform_0, window_bounds = array<i64: 200, 128>}, {pipeline_mode = #tpu.pipeline_mode<synchronous>, transform_indices = @transform_1, window_bounds = array<i64: 128, 128>}, {pipeline_mode = #tpu.pipeline_mode<synchronous>, transform_indices = @transform_2, window_bounds = array<i64: 1, 128>}, {pipeline_mode = #tpu.pipeline_mode<synchronous>, transform_indices = @transform_3, window_bounds = array<i64: 128, 128>}, {pipeline_mode = #tpu.pipeline_mode<synchronous>, transform_indices = @transform_4, window_bounds = array<i64: 1, 128>}, {pipeline_mode = #tpu.pipeline_mode<synchronous>, transform_indices = @transform_5, window_bounds = array<i64: 128, 128>}, {pipeline_mode = #tpu.pipeline_mode<synchronous>, transform_indices = @transform_6, window_bounds = array<i64: 1, 128>}, {transform_indices = @transform_7, window_bounds = array<i64: 200, 128>}]} {
    %c0 = arith.constant 0 : index
    %c0_0 = arith.constant 0 : index
    %0 = vector.load %arg1[%c0, %c0_0] : memref<200x128xf32, #tpu.memory_space<vmem>>, vector<200x128xf32>
    %c0_1 = arith.constant 0 : index
    %c0_2 = arith.constant 0 : index
    %1 = vector.load %arg2[%c0_1, %c0_2] : memref<128x128xf32, #tpu.memory_space<vmem>>, vector<128x128xf32>
    %c0_3 = arith.constant 0 : index
    %c0_4 = arith.constant 0 : index
    %2 = vector.load %arg3[%c0_3, %c0_4] : memref<1x128xf32, #tpu.memory_space<vmem>>, vector<1x128xf32>
    %cst = arith.constant dense<0.000000e+00> : vector<200x128xf32>
    %3 = tpu.matmul %0, %1, %cst {dimension_numbers = #tpu.dot_dimension_numbers<[1], [0], [0], [1], [0, 0, 1, 1], [], []>} : vector<200x128xf32>, vector<128x128xf32>, vector<200x128xf32> -> vector<200x128xf32>
    %4 = vector.broadcast %2 : vector<1x128xf32> to vector<200x128xf32>
    %5 = arith.addf %3, %4 : vector<200x128xf32>
    %cst_5 = arith.constant 0.000000e+00 : f32
    %6 = vector.broadcast %cst_5 : f32 to vector<200x128xf32>
    %7 = arith.maximumf %5, %6 : vector<200x128xf32>
    %c0_6 = arith.constant 0 : index
    %c0_7 = arith.constant 0 : index
    %8 = vector.load %arg4[%c0_6, %c0_7] : memref<128x128xf32, #tpu.memory_space<vmem>>, vector<128x128xf32>
    %c0_8 = arith.constant 0 : index
    %c0_9 = arith.constant 0 : index
    %9 = vector.load %arg5[%c0_8, %c0_9] : memref<1x128xf32, #tpu.memory_space<vmem>>, vector<1x128xf32>
    %cst_10 = arith.constant dense<0.000000e+00> : vector<200x128xf32>
    %10 = tpu.matmul %7, %8, %cst_10 {dimension_numbers = #tpu.dot_dimension_numbers<[1], [0], [0], [1], [0, 0, 1, 1], [], []>} : vector<200x128xf32>, vector<128x128xf32>, vector<200x128xf32> -> vector<200x128xf32>
    %11 = vector.broadcast %9 : vector<1x128xf32> to vector<200x128xf32>
    %12 = arith.addf %10, %11 : vector<200x128xf32>
    %cst_11 = arith.constant 0.000000e+00 : f32
    %13 = vector.broadcast %cst_11 : f32 to vector<200x128xf32>
    %14 = arith.maximumf %12, %13 : vector<200x128xf32>
    %c0_12 = arith.constant 0 : index
    %c0_13 = arith.constant 0 : index
    %15 = vector.load %arg6[%c0_12, %c0_13] : memref<128x128xf32, #tpu.memory_space<vmem>>, vector<128x128xf32>
    %c0_14 = arith.constant 0 : index
    %c0_15 = arith.constant 0 : index
    %16 = vector.load %arg7[%c0_14, %c0_15] : memref<1x128xf32, #tpu.memory_space<vmem>>, vector<1x128xf32>
    %cst_16 = arith.constant dense<0.000000e+00> : vector<200x128xf32>
    %17 = tpu.matmul %14, %15, %cst_16 {dimension_numbers = #tpu.dot_dimension_numbers<[1], [0], [0], [1], [0, 0, 1, 1], [], []>} : vector<200x128xf32>, vector<128x128xf32>, vector<200x128xf32> -> vector<200x128xf32>
    %18 = vector.broadcast %16 : vector<1x128xf32> to vector<200x128xf32>
    %19 = arith.addf %17, %18 : vector<200x128xf32>
    %c0_17 = arith.constant 0 : index
    %c0_18 = arith.constant 0 : index
    %20 = vector.load %arg8[%c0_17, %c0_18] : memref<200x128xf32, #tpu.memory_space<vmem>>, vector<200x128xf32>
    tpu.vector_store %arg8[%c0_17, %c0_18], %19 {strides = array<i32>} : memref<200x128xf32, #tpu.memory_space<vmem>>, vector<200x128xf32>,
    return
  }
  func.func @transform_0(%arg0: i32) -> (i32, i32) {
    %c0_i32 = arith.constant 0 : i32
    %c0_i32_0 = arith.constant 0 : i32
    return %arg0, %c0_i32 : i32, i32
  }
  func.func @transform_1(%arg0: i32) -> (i32, i32) {
    %c0_i32 = arith.constant 0 : i32
    %c0_i32_0 = arith.constant 0 : i32
    %c0_i32_1 = arith.constant 0 : i32
    return %c0_i32, %c0_i32_0 : i32, i32
  }
  func.func @transform_2(%arg0: i32) -> (i32, i32) {
    %c0_i32 = arith.constant 0 : i32
    %c0_i32_0 = arith.constant 0 : i32
    %c0_i32_1 = arith.constant 0 : i32
    return %c0_i32, %c0_i32_0 : i32, i32
  }
  func.func @transform_3(%arg0: i32) -> (i32, i32) {
    %c0_i32 = arith.constant 0 : i32
    %c0_i32_0 = arith.constant 0 : i32
    %c0_i32_1 = arith.constant 0 : i32
    return %c0_i32, %c0_i32_0 : i32, i32
  }
  func.func @transform_4(%arg0: i32) -> (i32, i32) {
    %c0_i32 = arith.constant 0 : i32
    %c0_i32_0 = arith.constant 0 : i32
    %c0_i32_1 = arith.constant 0 : i32
    return %c0_i32, %c0_i32_0 : i32, i32
  }
  func.func @transform_5(%arg0: i32) -> (i32, i32) {
    %c0_i32 = arith.constant 0 : i32
    %c0_i32_0 = arith.constant 0 : i32
    %c0_i32_1 = arith.constant 0 : i32
    return %c0_i32, %c0_i32_0 : i32, i32
  }
  func.func @transform_6(%arg0: i32) -> (i32, i32) {
    %c0_i32 = arith.constant 0 : i32
    %c0_i32_0 = arith.constant 0 : i32
    %c0_i32_1 = arith.constant 0 : i32
    return %c0_i32, %c0_i32_0 : i32, i32
  }
  func.func @transform_7(%arg0: i32) -> (i32, i32) {
    %c0_i32 = arith.constant 0 : i32
    %c0_i32_0 = arith.constant 0 : i32
    return %arg0, %c0_i32 : i32, i32
  }
}

module attributes {stable_mosaic.version = 11 : i64} {
  func.func @_mlp_kernel(%arg0: i32, %arg1: memref<200x128xf32, #tpu.memory_space<vmem>>, %arg2: memref<128x128xf32, #tpu.memory_space<vmem>>, %arg3: memref<1x128xf32, #tpu.memory_space<vmem>>, %arg4: memref<128x128xf32, #tpu.memory_space<vmem>>, %arg5: memref<1x128xf32, #tpu.memory_space<vmem>>, %arg6: memref<128x128xf32, #tpu.memory_space<vmem>>, %arg7: memref<1x128xf32, #tpu.memory_space<vmem>>, %arg8: memref<200x128xf32, #tpu.memory_space<vmem>>) attributes {dimension_semantics = [#tpu.dimension_semantics<parallel>], iteration_bounds = array<i64: 1>, scalar_prefetch = 0 : i64, scratch_operands = 0 : i64, tpu.core_type = #tpu.core_type<tc>, window_params = [{transform_indices = @transform_0, window_bounds = array<i64: 200, 128>}, {pipeline_mode = #tpu.pipeline_mode<synchronous>, transform_indices = @transform_1, window_bounds = array<i64: 128, 128>}, {pipeline_mode = #tpu.pipeline_mode<synchronous>, transform_indices = @transform_2, window_bounds = array<i64: 1, 128>}, {pipeline_mode = #tpu.pipeline_mode<synchronous>, transform_indices = @transform_3, window_bounds = array<i64: 128, 128>}, {pipeline_mode = #tpu.pipeline_mode<synchronous>, transform_indices = @transform_4, window_bounds = array<i64: 1, 128>}, {pipeline_mode = #tpu.pipeline_mode<synchronous>, transform_indices = @transform_5, window_bounds = array<i64: 128, 128>}, {pipeline_mode = #tpu.pipeline_mode<synchronous>, transform_indices = @transform_6, window_bounds = array<i64: 1, 128>}, {transform_indices = @transform_7, window_bounds = array<i64: 200, 128>}]} {
    %c0 = arith.constant 0 : index
    %c0_0 = arith.constant 0 : index
    %0 = vector.load %arg1[%c0, %c0_0] : memref<200x128xf32, #tpu.memory_space<vmem>>, vector<200x128xf32>
    %c0_1 = arith.constant 0 : index
    %c0_2 = arith.constant 0 : index
    %1 = vector.load %arg2[%c0_1, %c0_2] : memref<128x128xf32, #tpu.memory_space<vmem>>, vector<128x128xf32>
    %c0_3 = arith.constant 0 : index
    %c0_4 = arith.constant 0 : index
    %2 = vector.load %arg3[%c0_3, %c0_4] : memref<1x128xf32, #tpu.memory_space<vmem>>, vector<1x128xf32>
    %cst = arith.constant dense<0.000000e+00> : vector<200x128xf32>
    %3 = tpu.matmul %0, %1, %cst {dimension_numbers = #tpu.dot_dimension_numbers<[1], [0], [0], [1], [0, 0, 1, 1], [], []>} : vector<200x128xf32>, vector<128x128xf32>, vector<200x128xf32> -> vector<200x128xf32>
    %4 = vector.broadcast %2 : vector<1x128xf32> to vector<200x128xf32>
    %5 = arith.addf %3, %4 : vector<200x128xf32>
    %cst_5 = arith.constant 0.000000e+00 : f32
    %6 = vector.broadcast %cst_5 : f32 to vector<200x128xf32>
    %7 = arith.maximumf %5, %6 : vector<200x128xf32>
    %c0_6 = arith.constant 0 : index
    %c0_7 = arith.constant 0 : index
    %8 = vector.load %arg4[%c0_6, %c0_7] : memref<128x128xf32, #tpu.memory_space<vmem>>, vector<128x128xf32>
    %c0_8 = arith.constant 0 : index
    %c0_9 = arith.constant 0 : index
    %9 = vector.load %arg5[%c0_8, %c0_9] : memref<1x128xf32, #tpu.memory_space<vmem>>, vector<1x128xf32>
    %cst_10 = arith.constant dense<0.000000e+00> : vector<200x128xf32>
    %10 = tpu.matmul %7, %8, %cst_10 {dimension_numbers = #tpu.dot_dimension_numbers<[1], [0], [0], [1], [0, 0, 1, 1], [], []>} : vector<200x128xf32>, vector<128x128xf32>, vector<200x128xf32> -> vector<200x128xf32>
    %11 = vector.broadcast %9 : vector<1x128xf32> to vector<200x128xf32>
    %12 = arith.addf %10, %11 : vector<200x128xf32>
    %cst_11 = arith.constant 0.000000e+00 : f32
    %13 = vector.broadcast %cst_11 : f32 to vector<200x128xf32>
    %14 = arith.maximumf %12, %13 : vector<200x128xf32>
    %c0_12 = arith.constant 0 : index
    %c0_13 = arith.constant 0 : index
    %15 = vector.load %arg6[%c0_12, %c0_13] : memref<128x128xf32, #tpu.memory_space<vmem>>, vector<128x128xf32>
    %c0_14 = arith.constant 0 : index
    %c0_15 = arith.constant 0 : index
    %16 = vector.load %arg7[%c0_14, %c0_15] : memref<1x128xf32, #tpu.memory_space<vmem>>, vector<1x128xf32>
    %cst_16 = arith.constant dense<0.000000e+00> : vector<200x128xf32>
    %17 = tpu.matmul %14, %15, %cst_16 {dimension_numbers = #tpu.dot_dimension_numbers<[1], [0], [0], [1], [0, 0, 1, 1], [], []>} : vector<200x128xf32>, vector<128x128xf32>, vector<200x128xf32> -> vector<200x128xf32>
    %18 = vector.broadcast %16 : vector<1x128xf32> to vector<200x128xf32>
    %19 = arith.addf %17, %18 : vector<200x128xf32>
    %c0_17 = arith.constant 0 : index
    %c0_18 = arith.constant 0 : index
    %20 = vector.load %arg8[%c0_17, %c0_18] : memref<200x128xf32, #tpu.memory_space<vmem>>, vector<200x128xf32>
    tpu.vector_store %arg8[%c0_17, %c0_18], %19 {strides = array<i32>} : memref<200x128xf32, #tpu.memory_space<vmem>>, vector<200x128xf32>,
    return
  }
  func.func @transform_0(%arg0: i32) -> (i32, i32) {
    %c0_i32 = arith.constant 0 : i32
    %c0_i32_0 = arith.constant 0 : i32
    return %arg0, %c0_i32 : i32, i32
  }
  func.func @transform_1(%arg0: i32) -> (i32, i32) {
    %c0_i32 = arith.constant 0 : i32
    %c0_i32_0 = arith.constant 0 : i32
    %c0_i32_1 = arith.constant 0 : i32
    return %c0_i32, %c0_i32_0 : i32, i32
  }
  func.func @transform_2(%arg0: i32) -> (i32, i32) {
    %c0_i32 = arith.constant 0 : i32
    %c0_i32_0 = arith.constant 0 : i32
    %c0_i32_1 = arith.constant 0 : i32
    return %c0_i32, %c0_i32_0 : i32, i32
  }
  func.func @transform_3(%arg0: i32) -> (i32, i32) {
    %c0_i32 = arith.constant 0 : i32
    %c0_i32_0 = arith.constant 0 : i32
    %c0_i32_1 = arith.constant 0 : i32
    return %c0_i32, %c0_i32_0 : i32, i32
  }
  func.func @transform_4(%arg0: i32) -> (i32, i32) {
    %c0_i32 = arith.constant 0 : i32
    %c0_i32_0 = arith.constant 0 : i32
    %c0_i32_1 = arith.constant 0 : i32
    return %c0_i32, %c0_i32_0 : i32, i32
  }
  func.func @transform_5(%arg0: i32) -> (i32, i32) {
    %c0_i32 = arith.constant 0 : i32
    %c0_i32_0 = arith.constant 0 : i32
    %c0_i32_1 = arith.constant 0 : i32
    return %c0_i32, %c0_i32_0 : i32, i32
  }
  func.func @transform_6(%arg0: i32) -> (i32, i32) {
    %c0_i32 = arith.constant 0 : i32
    %c0_i32_0 = arith.constant 0 : i32
    %c0_i32_1 = arith.constant 0 : i32
    return %c0_i32, %c0_i32_0 : i32, i32
  }
  func.func @transform_7(%arg0: i32) -> (i32, i32) {
    %c0_i32 = arith.constant 0 : i32
    %c0_i32_0 = arith.constant 0 : i32
    return %arg0, %c0_i32 : i32, i32
  }
}

</mosaic_0001>

<bundles_post_ra>
// kernel: tpu_custom_call.1
= control target key start
LH: loop header
LB: loop body
LE: loop exit
PB: predicated region body
PF: predicated region fallthrough
CT: control target
= control target key end

     0   :  { %12 = vsyncpa [#allocation3], 0  ;;  %s900_s0 = inlined_call_operand.hbm [shape: f32[200,128], index: 0, kind: input, shape index: {}]   ;;  %s901_s1 = inlined_call_operand.hbm [shape: f32[128,128], index: 1, kind: input, shape index: {}]   ;;  %s902_s2 = inlined_call_operand.vmem [shape: f32[1,128], index: 2, kind: input, shape index: {}]   ;;  %s903_s3 = inlined_call_operand.hbm [shape: f32[128,128], index: 3, kind: input, shape index: {}]   ;;  %s904_s4 = inlined_call_operand.vmem [shape: f32[1,128], index: 4, kind: input, shape index: {}]   ;;  %s905_s5 = inlined_call_operand.hbm [shape: f32[128,128], index: 5, kind: input, shape index: {}]   ;;  %s906_s6 = inlined_call_operand.vmem [shape: f32[1,128], index: 6, kind: input, shape index: {}]   ;;  %s907_s7 = inlined_call_operand.hbm [shape: f32[200,128], index: 7, kind: output, shape index: {}]  }
   0x1   :  { %13 = vsyncpa [#allocation6], 0 }
   0x2   :  { %14 = vsyncpa [#allocation9], 0 }
   0x3   :  { %15 = vsyncpa [#allocation4], 0  ;;  %s33_s26 = sshll.u32 %s901_s1, 4  ;;  %s733_s27 = smov [#allocation5]   ;;  %s34_s26 = int_to_ptr.hbm [resolvable:$true] %s33_s26 }
   0x4   :  { %s35_s28 = sshll.u32 %s733_s27, 4  ;;  %s20_s8 = sshll.u32 %s900_s0, 4  ;;  %s36_s28 = int_to_ptr.vmem [resolvable:$true] %s35_s28  ;;  %s21_s8 = int_to_ptr.hbm [resolvable:$true] %s20_s8 }
   0x5   :  { %s734_s9 = smov 128   ;;  %s735_s10 = smov 8  }
   0x6   :  { %41 = dma.hbm_to_vmem [thread:$0]  %s34_s26, 2048, %s36_s28, [#allocation6], %s734_s9, %s734_s9, %s735_s10  }
   0x7   :  { %s736_s11 = smov [#allocation2]   ;;  %s48_s1 = sshll.u32 %s903_s3, 4  ;;  %s49_s1 = int_to_ptr.hbm [resolvable:$true] %s48_s1 }
   0x8   :  { %s22_s12 = sshll.u32 %s736_s11, 4  ;;  %s63_s16 = sshll.u32 %s905_s5, 4  ;;  %s23_s12 = int_to_ptr.vmem [resolvable:$true] %s22_s12  ;;  %s64_s16 = int_to_ptr.hbm [resolvable:$true] %s63_s16 }
   0x9   :  { %28 = dma.hbm_to_vmem [thread:$0]  %s21_s8, 3200, %s23_s12, [#allocation3], %s734_s9, %s734_s9, %s735_s10  }
   0xa   :  { %s737_s17 = smov [#allocation7]   ;;  %s738_s19 = smov [#allocation8]  }
   0xb   :  { %s50_s18 = sshll.u32 %s737_s17, 4  ;;  %s65_s3 = sshll.u32 %s738_s19, 4  ;;  %s51_s18 = int_to_ptr.vmem [resolvable:$true] %s50_s18  ;;  %s66_s3 = int_to_ptr.vmem [resolvable:$true] %s65_s3 }
   0xc   :  { %56 = dma.hbm_to_vmem [thread:$0]  %s49_s1, 2048, %s51_s18, [#allocation6], %s734_s9, %s734_s9, %s735_s10  }
   0xd   :  { %71 = dma.hbm_to_vmem [thread:$0]  %s64_s16, 2048, %s66_s3, [#allocation9], %s734_s9, %s734_s9, %s735_s10  }
   0xe   :  { %725 = dma.done.wait [#allocation3], 3200  }
   0xf   :  { %726 = vsyncadd [#allocation3], 4294964096 }
  0x10   :  { %727 = dma.done.wait [#allocation6], 4096  }
  0x11   :  { %728 = vsyncadd [#allocation6], 4294963200 }
  0x12   :  { %729 = dma.done.wait [#allocation9], 2048  }
  0x13   :  { %730 = vsyncadd [#allocation9], 4294965248  ;;  %v130_v0 = vld [vmem:[#allocation5 + $0x78] sm:$0xff]  ;;  %v129_v1 = vld [vmem:[#allocation5 + $0x70] sm:$0xff]  ;;  %s532_s26 = sshll.u32 %s907_s7, 4  ;;  %s533_s26 = int_to_ptr.hbm [resolvable:$true] %s532_s26 }
  0x14   :  { %135 = vmatpush.msra.mxu0 %v130_v0  ;;  %547 = vmatpush.msra.mxu3 %v130_v0  ;;  %v128_v2 = vld [vmem:[#allocation5 + $0x68] sm:$0xff]  ;;  %v127_v3 = vld [vmem:[#allocation5 + $0x60] sm:$0xff]  ;;  %v126_v4 = vld [vmem:[#allocation5 + $0x58] sm:$0xff] }
  0x15   :  { %v125_v5 = vld [vmem:[#allocation5 + $0x50] sm:$0xff]  ;;  %v124_v6 = vld [vmem:[#allocation5 + $0x48] sm:$0xff]  ;;  %v123_v7 = vld [vmem:[#allocation5 + $0x40] sm:$0xff] }
  0x16   :  { %136 = vmatpush.msra.mxu0 %v129_v1  ;;  %548 = vmatpush.msra.mxu3 %v129_v1  ;;  %v122_v8 = vld [vmem:[#allocation5 + $0x38] sm:$0xff]  ;;  %v121_v9 = vld [vmem:[#allocation5 + $0x30] sm:$0xff]  ;;  %v120_v10 = vld [vmem:[#allocation5 + $0x28] sm:$0xff] }
  0x17   :  { %v119_v11 = vld [vmem:[#allocation5 + $0x20] sm:$0xff]  ;;  %v118_v12 = vld [vmem:[#allocation5 + $0x18] sm:$0xff]  ;;  %v117_v13 = vld [vmem:[#allocation5 + $0x10] sm:$0xff] }
  0x18   :  { %137 = vmatpush.msra.mxu0 %v128_v2  ;;  %549 = vmatpush.msra.mxu3 %v128_v2  ;;  %v116_v14 = vld [vmem:[#allocation5 + $0x8] sm:$0xff]  ;;  %v115_v15 = vld [vmem:[#allocation5] sm:$0xff]  ;;  %v90_v16 = vld [vmem:[#allocation2] sm:$0xff] }
  0x19   :  { %v91_v17 = vld [vmem:[#allocation2 + $0x8] sm:$0xff]  ;;  %v92_v18 = vld [vmem:[#allocation2 + $0x10] sm:$0xff]  ;;  %v93_v19 = vld [vmem:[#allocation2 + $0x18] sm:$0xff] }
  0x1a   :  { %138 = vmatpush.msra.mxu0 %v127_v3  ;;  %550 = vmatpush.msra.mxu3 %v127_v3  ;;  %v94_v20 = vld [vmem:[#allocation2 + $0x20] sm:$0xff]  ;;  %v95_v21 = vld [vmem:[#allocation2 + $0x28] sm:$0xff]  ;;  %v96_v22 = vld [vmem:[#allocation2 + $0x30] sm:$0xff] }
  0x1b   :  { %v97_v23 = vld [vmem:[#allocation2 + $0x38] sm:$0xff]  ;;  %v98_v25 = vld [vmem:[#allocation2 + $0x40] sm:$0xff]  ;;  %v265_v29 = vld [vmem:[#allocation7 + $0x68] sm:$0xff] }
  0x1c   :  { %139 = vmatpush.msra.mxu0 %v126_v4  ;;  %551 = vmatpush.msra.mxu3 %v126_v4  ;;  %v109_v24 = vld [vmem:[#allocation2 + $0x98] sm:$0xff]  ;;  %v267_v26 = vld [vmem:[#allocation7 + $0x78] sm:$0xff]  ;;  %v99_v30 = vld [vmem:[#allocation2 + $0x48] sm:$0xff] }
  0x1d   :  { %v110_v27 = vld [vmem:[#allocation2 + $0xa0] sm:$0xff]  ;;  %v266_v28 = vld [vmem:[#allocation7 + $0x70] sm:$0xff]  ;;  %272 = vmatpush.msra.mxu1 %v267_v26  ;;  %v264_v31 = vld [vmem:[#allocation7 + $0x60] sm:$0xff] }
  0x1e   :  { %140 = vmatpush.msra.mxu0 %v125_v5  ;;  %552 = vmatpush.msra.mxu3 %v125_v5  ;;  %v263_v32 = vld [vmem:[#allocation7 + $0x58] sm:$0xff]  ;;  %v111_v33 = vld [vmem:[#allocation2 + $0xa8] sm:$0xff]  ;;  %v262_v34 = vld [vmem:[#allocation7 + $0x50] sm:$0xff] }
  0x1f   :  { %273 = vmatpush.msra.mxu1 %v266_v28  ;;  %v261_v35 = vld [vmem:[#allocation7 + $0x48] sm:$0xff]  ;;  %v260_v37 = vld [vmem:[#allocation7 + $0x40] sm:$0xff]  ;;  %v259_v38 = vld [vmem:[#allocation7 + $0x38] sm:$0xff] }
  0x20   :  { %141 = vmatpush.msra.mxu0 %v124_v6  ;;  %553 = vmatpush.msra.mxu3 %v124_v6  ;;  %v100_v36 = vld [vmem:[#allocation2 + $0x50] sm:$0xff]  ;;  %v258_v40 = vld [vmem:[#allocation7 + $0x30] sm:$0xff]  ;;  %v256_v43 = vld [vmem:[#allocation7 + $0x20] sm:$0xff] }
  0x21   :  { %274 = vmatpush.msra.mxu1 %v265_v29  ;;  %v112_v39 = vld [vmem:[#allocation2 + $0xb0] sm:$0xff]  ;;  %v101_v42 = vld [vmem:[#allocation2 + $0x58] sm:$0xff]  ;;  %v255_v44 = vld [vmem:[#allocation7 + $0x18] sm:$0xff] }
  0x22   :  { %142 = vmatpush.msra.mxu0 %v123_v7  ;;  %554 = vmatpush.msra.mxu3 %v123_v7  ;;  %v257_v41 = vld [vmem:[#allocation7 + $0x28] sm:$0xff]  ;;  %v113_v45 = vld [vmem:[#allocation2 + $0xb8] sm:$0xff]  ;;  %v102_v47 = vld [vmem:[#allocation2 + $0x60] sm:$0xff] }
  0x23   :  { %275 = vmatpush.msra.mxu1 %v264_v31  ;;  %v254_v46 = vld [vmem:[#allocation7 + $0x10] sm:$0xff]  ;;  %v253_v48 = vld [vmem:[#allocation7 + $0x8] sm:$0xff]  ;;  %v252_v49 = vld [vmem:[#allocation7] sm:$0xff] }
  0x24   :  { %143 = vmatpush.msra.mxu0 %v122_v8  ;;  %555 = vmatpush.msra.mxu3 %v122_v8  ;;  %v114_v50 = vld [vmem:[#allocation2 + $0xc0] sm:$0xff]  ;;  %v103_v51 = vld [vmem:[#allocation2 + $0x68] sm:$0xff]  ;;  %v104_v52 = vld [vmem:[#allocation2 + $0x70] sm:$0xff] }
  0x25   :  { %276 = vmatpush.msra.mxu1 %v263_v32  ;;  %v105_v53 = vld [vmem:[#allocation2 + $0x78] sm:$0xff]  ;;  %v807_v54 = vld [vmem:[%s902_s2] ss:$0 sm:$0xff]  ;;  %v107_v60 = vld [vmem:[#allocation2 + $0x88] sm:$0xff] }
  0x26   :  { %144 = vmatpush.msra.mxu0 %v121_v9  ;;  %556 = vmatpush.msra.mxu3 %v121_v9  ;;  %v106_v56 = vld [vmem:[#allocation2 + $0x80] sm:$0xff]  ;;  %v108_v0 = vld [vmem:[#allocation2 + $0x90] sm:$0xff] }
  0x27   :  { %277 = vmatpush.msra.mxu1 %v262_v34 }
  0x28   :  { %145 = vmatpush.msra.mxu0 %v120_v10  ;;  %557 = vmatpush.msra.mxu3 %v120_v10 }
  0x29   :  { %278 = vmatpush.msra.mxu1 %v261_v35 }
  0x2a   :  { %146 = vmatpush.msra.mxu0 %v119_v11  ;;  %558 = vmatpush.msra.mxu3 %v119_v11 }
  0x2b   :  { %279 = vmatpush.msra.mxu1 %v260_v37 }
  0x2c   :  { %147 = vmatpush.msra.mxu0 %v118_v12  ;;  %559 = vmatpush.msra.mxu3 %v118_v12 }
  0x2d   :  { %280 = vmatpush.msra.mxu1 %v259_v38 }
  0x2e   :  { %148 = vmatpush.msra.mxu0 %v117_v13  ;;  %560 = vmatpush.msra.mxu3 %v117_v13 }
  0x2f   :  { %281 = vmatpush.msra.mxu1 %v258_v40 }
  0x30   :  { %149 = vmatpush.msra.mxu0 %v116_v14  ;;  %561 = vmatpush.msra.mxu3 %v116_v14 }
  0x31   :  { %282 = vmatpush.msra.mxu1 %v257_v41 }
  0x32   :  { %150 = vmatpush.msra.mxu0 %v115_v15  ;;  %562 = vmatpush.msra.mxu3 %v115_v15 }
  0x33   :  { %151 = vmatmul.f32.vlgmr.msra.gmra.mxu0 %v90_v16  ;;  %208 = vmatmul.f32.vlgmr.msra.gmra.mxu3 %v109_v24  ;;  %v404_v24 = vld [vmem:[#allocation8 + $0x78] sm:$0xff] }
  0x34   :  { %563 = vmatpush.msrb.mxu3 %v267_v26  ;;  %283 = vmatpush.msra.mxu1 %v256_v43 }
  0x35   :  { %409 = vmatpush.msra.mxu2 %v404_v24 }
  0x36   :  { %564 = vmatpush.msrb.mxu3 %v266_v28  ;;  %284 = vmatpush.msra.mxu1 %v255_v44 }
  0x38   :  { %565 = vmatpush.msrb.mxu3 %v265_v29  ;;  %285 = vmatpush.msra.mxu1 %v254_v46 }
  0x3a   :  { %566 = vmatpush.msrb.mxu3 %v264_v31  ;;  %286 = vmatpush.msra.mxu1 %v253_v48  ;;  %v402_v31 = vld [vmem:[#allocation8 + $0x68] sm:$0xff] }
  0x3b   :  { %154 = vmatmul.f32.gmra.mxu0 %v91_v17  ;;  %211 = vmatmul.f32.gmra.mxu3 %v110_v27  ;;  %v403_v27 = vld [vmem:[#allocation8 + $0x70] sm:$0xff] }
  0x3c   :  { %567 = vmatpush.msrb.mxu3 %v263_v32  ;;  %287 = vmatpush.msra.mxu1 %v252_v49 }
  0x3d   :  { %410 = vmatpush.msra.mxu2 %v403_v27 }
  0x3e   :  { %568 = vmatpush.msrb.mxu3 %v262_v34  ;;  %v400_v34 = vld [vmem:[#allocation8 + $0x58] sm:$0xff] }
  0x3f   :  { %411 = vmatpush.msra.mxu2 %v402_v31 }
  0x40   :  { %569 = vmatpush.msrb.mxu3 %v261_v35 }
  0x42   :  { %570 = vmatpush.msrb.mxu3 %v260_v37  ;;  %v399_v37 = vld [vmem:[#allocation8 + $0x50] sm:$0xff] }
  0x43   :  { %157 = vmatmul.f32.gmra.mxu0 %v92_v18  ;;  %214 = vmatmul.f32.gmra.mxu3 %v111_v33  ;;  %v401_v33 = vld [vmem:[#allocation8 + $0x60] sm:$0xff] }
  0x44   :  { %571 = vmatpush.msrb.mxu3 %v259_v38  ;;  %412 = vmatpush.msra.mxu2 %v401_v33 }
  0x46   :  { %572 = vmatpush.msrb.mxu3 %v258_v40  ;;  %413 = vmatpush.msra.mxu2 %v400_v34 }
  0x48   :  { %573 = vmatpush.msrb.mxu3 %v257_v41  ;;  %414 = vmatpush.msra.mxu2 %v399_v37  ;;  %v398_v41 = vld [vmem:[#allocation8 + $0x48] sm:$0xff] }
  0x4a   :  { %574 = vmatpush.msrb.mxu3 %v256_v43  ;;  %415 = vmatpush.msra.mxu2 %v398_v41  ;;  %v397_v43 = vld [vmem:[#allocation8 + $0x40] sm:$0xff] }
  0x4b   :  { %160 = vmatmul.f32.gmra.mxu0 %v93_v19  ;;  %217 = vmatmul.f32.gmra.mxu3 %v112_v39 }
  0x4c   :  { %575 = vmatpush.msrb.mxu3 %v255_v44  ;;  %416 = vmatpush.msra.mxu2 %v397_v43  ;;  %v396_v44 = vld [vmem:[#allocation8 + $0x38] sm:$0xff] }
  0x4e   :  { %576 = vmatpush.msrb.mxu3 %v254_v46  ;;  %417 = vmatpush.msra.mxu2 %v396_v44 }
  0x50   :  { %577 = vmatpush.msrb.mxu3 %v253_v48 }
  0x52   :  { %578 = vmatpush.msrb.mxu3 %v252_v49 }
  0x53   :  { %163 = vmatmul.f32.gmra.mxu0 %v94_v20  ;;  %220 = vmatmul.f32.gmra.mxu3 %v113_v45 }
  0x54   :  { %579 = vmatpush.msra.mxu3 %v404_v24 }
  0x56   :  { %580 = vmatpush.msra.mxu3 %v403_v27 }
  0x58   :  { %581 = vmatpush.msra.mxu3 %v402_v31 }
  0x5a   :  { %582 = vmatpush.msra.mxu3 %v401_v33 }
  0x5b   :  { %166 = vmatmul.f32.gmra.mxu0 %v95_v21  ;;  %223 = vmatmul.f32.gmra.mxu3 %v114_v50 }
  0x5c   :  { %583 = vmatpush.msra.mxu3 %v400_v34 }
  0x5e   :  { %584 = vmatpush.msra.mxu3 %v399_v37 }
  0x60   :  { %585 = vmatpush.msra.mxu3 %v398_v41 }
  0x62   :  { %586 = vmatpush.msra.mxu3 %v397_v43 }
  0x63   :  { %169 = vmatmul.f32.gmra.mxu0 %v96_v22 }
  0x64   :  { %587 = vmatpush.msra.mxu3 %v396_v44 }
  0x6b   :  { %172 = vmatmul.f32.gmra.mxu0 %v97_v23 }
  0x73   :  { %175 = vmatmul.f32.gmra.mxu0 %v98_v25 }
  0x7b   :  { %178 = vmatmul.f32.gmra.mxu0 %v99_v30 }
  0x83   :  { %181 = vmatmul.f32.gmra.mxu0 %v100_v36 }
  0x8b   :  { %184 = vmatmul.f32.gmra.mxu0 %v101_v42 }
  0x93   :  { %187 = vmatmul.f32.gmra.mxu0 %v102_v47  ;;  %v395_v47 = vld [vmem:[#allocation8 + $0x30] sm:$0xff] }
  0x94   :  { %418 = vmatpush.msra.mxu2 %v395_v47  ;;  %588 = vmatpush.msra.mxu3 %v395_v47 }
  0x9b   :  { %190 = vmatmul.f32.gmra.mxu0 %v103_v51  ;;  %v394_v51 = vld [vmem:[#allocation8 + $0x28] sm:$0xff] }
  0x9c   :  { %419 = vmatpush.msra.mxu2 %v394_v51  ;;  %589 = vmatpush.msra.mxu3 %v394_v51 }
  0xa3   :  { %193 = vmatmul.f32.gmra.mxu0 %v104_v52 }
  0xab   :  { %196 = vmatmul.f32.gmra.mxu0 %v105_v53  ;;  %v393_v53 = vld [vmem:[#allocation8 + $0x20] sm:$0xff] }
  0xac   :  { %420 = vmatpush.msra.mxu2 %v393_v53  ;;  %590 = vmatpush.msra.mxu3 %v393_v53 }
  0xb0   :  { %v152_v55 = vpop.f32.mrf.mxu0 }
  0xb1   :  { %v153_v57 = vadd.f32 %v807_v54, %v152_v55  ;;  %v392_v55 = vld [vmem:[#allocation8 + $0x18] sm:$0xff] }
  0xb2   :  { %421 = vmatpush.msra.mxu2 %v392_v55  ;;  %591 = vmatpush.msra.mxu3 %v392_v55 }
  0xb3   :  { %v227_v58 = vmax.f32 %v153_v57, 0.0  ;;  %199 = vmatmul.f32.gmra.mxu0 %v106_v56 }
  0xb5   :  { %288 = vmatmul.f32.vlgmr.msra.gmra.mxu1 %v227_v58  ;;  %v391_v58 = vld [vmem:[#allocation8 + $0x10] sm:$0xff] }
  0xb6   :  { %v209_v20 = vpop.f32.mrf.mxu3  ;;  %422 = vmatpush.msra.mxu2 %v391_v58  ;;  %592 = vmatpush.msra.mxu3 %v391_v58 }
  0xb7   :  { %v210_v22 = vadd.f32 %v807_v54, %v209_v20 }
  0xb8   :  { %v155_v59 = vpop.f32.mrf.mxu0 }
  0xb9   :  { %v156_v61 = vadd.f32 %v807_v54, %v155_v59  ;;  %v246_v23 = vmax.f32 %v210_v22, 0.0 }
  0xbb   :  { %v228_v62 = vmax.f32 %v156_v61, 0.0  ;;  %202 = vmatmul.f32.gmra.mxu0 %v107_v60  ;;  %345 = vmatmul.f32.vlgmr.msrb.gmra.mxu3 %v246_v23 }
  0xbd   :  { %291 = vmatmul.f32.gmra.mxu1 %v228_v62  ;;  %v390_v62 = vld [vmem:[#allocation8 + $0x8] sm:$0xff] }
  0xbe   :  { %v212_v28 = vpop.f32.mrf.mxu3  ;;  %423 = vmatpush.msra.mxu2 %v390_v62  ;;  %593 = vmatpush.msra.mxu3 %v390_v62 }
  0xbf   :  { %v213_v30 = vadd.f32 %v807_v54, %v212_v28 }
  0xc0   :  { %v158_v63 = vpop.f32.mrf.mxu0 }
  0xc1   :  { %v159_v1 = vadd.f32 %v807_v54, %v158_v63  ;;  %v247_v32 = vmax.f32 %v213_v30, 0.0 }
  0xc3   :  { %v229_v2 = vmax.f32 %v159_v1, 0.0  ;;  %205 = vmatmul.f32.gmra.mxu0 %v108_v0  ;;  %348 = vmatmul.f32.gmra.mxu3 %v247_v32  ;;  %v389_v0 = vld [vmem:[#allocation8] sm:$0xff] }
  0xc4   :  { %424 = vmatpush.msra.mxu2 %v389_v0  ;;  %594 = vmatpush.msra.mxu3 %v389_v0 }
  0xc5   :  { %294 = vmatmul.f32.gmra.mxu1 %v229_v2 }
  0xc6   :  { %v215_v38 = vpop.f32.mrf.mxu3 }
  0xc7   :  { %v216_v40 = vadd.f32 %v807_v54, %v215_v38 }
  0xc8   :  { %v161_v3 = vpop.f32.mrf.mxu0 }
  0xc9   :  { %v162_v4 = vadd.f32 %v807_v54, %v161_v3  ;;  %v248_v42 = vmax.f32 %v216_v40, 0.0 }
  0xcb   :  { %v230_v5 = vmax.f32 %v162_v4, 0.0  ;;  %351 = vmatmul.f32.gmra.mxu3 %v248_v42 }
  0xcd   :  { %297 = vmatmul.f32.gmra.mxu1 %v230_v5 }
  0xce   :  { %v218_v48 = vpop.f32.mrf.mxu3 }
  0xcf   :  { %v219_v50 = vadd.f32 %v807_v54, %v218_v48 }
  0xd0   :  { %v164_v6 = vpop.f32.mrf.mxu0 }
  0xd1   :  { %v165_v7 = vadd.f32 %v807_v54, %v164_v6  ;;  %v249_v52 = vmax.f32 %v219_v50, 0.0 }
  0xd3   :  { %v231_v8 = vmax.f32 %v165_v7, 0.0  ;;  %354 = vmatmul.f32.gmra.mxu3 %v249_v52 }
  0xd5   :  { %300 = vmatmul.f32.gmra.mxu1 %v231_v8 }
  0xd6   :  { %v221_v59 = vpop.f32.mrf.mxu3 }
  0xd7   :  { %v222_v61 = vadd.f32 %v807_v54, %v221_v59 }
  0xd8   :  { %v167_v9 = vpop.f32.mrf.mxu0 }
  0xd9   :  { %v168_v10 = vadd.f32 %v807_v54, %v167_v9  ;;  %v250_v63 = vmax.f32 %v222_v61, 0.0 }
  0xdb   :  { %v232_v11 = vmax.f32 %v168_v10, 0.0  ;;  %357 = vmatmul.f32.gmra.mxu3 %v250_v63 }
  0xdd   :  { %303 = vmatmul.f32.gmra.mxu1 %v232_v11 }
  0xde   :  { %v224_v3 = vpop.f32.mrf.mxu3 }
  0xdf   :  { %v225_v5 = vadd.f32 %v807_v54, %v224_v3 }
  0xe0   :  { %v170_v12 = vpop.f32.mrf.mxu0 }
  0xe1   :  { %v171_v13 = vadd.f32 %v807_v54, %v170_v12  ;;  %v251_v6 = vmax.f32 %v225_v5, 0.0 }
  0xe3   :  { %v233_v14 = vmax.f32 %v171_v13, 0.0  ;;  %360 = vmatmul.f32.gmra.mxu3 %v251_v6  ;;  %v834_v13 = vld [vmem:[%s904_s4] ss:$0 sm:$0xff] }
  0xe5   :  { %306 = vmatmul.f32.gmra.mxu1 %v233_v14 }
  0xe8   :  { %v173_v15 = vpop.f32.mrf.mxu0 }
  0xe9   :  { %v174_v16 = vadd.f32 %v807_v54, %v173_v15 }
  0xeb   :  { %v234_v17 = vmax.f32 %v174_v16, 0.0 }
  0xed   :  { %309 = vmatmul.f32.gmra.mxu1 %v234_v17 }
  0xf0   :  { %v176_v18 = vpop.f32.mrf.mxu0 }
  0xf1   :  { %v177_v19 = vadd.f32 %v807_v54, %v176_v18 }
  0xf3   :  { %v235_v21 = vmax.f32 %v177_v19, 0.0 }
  0xf5   :  { %312 = vmatmul.f32.gmra.mxu1 %v235_v21 }
  0xf8   :  { %v179_v25 = vpop.f32.mrf.mxu0 }
  0xf9   :  { %v180_v26 = vadd.f32 %v807_v54, %v179_v25 }
  0xfb   :  { %v236_v29 = vmax.f32 %v180_v26, 0.0 }
  0xfd   :  { %315 = vmatmul.f32.gmra.mxu1 %v236_v29 }
 0x100   :  { %v182_v35 = vpop.f32.mrf.mxu0 }
 0x101   :  { %v183_v36 = vadd.f32 %v807_v54, %v182_v35 }
 0x103   :  { %v237_v39 = vmax.f32 %v183_v36, 0.0 }
 0x105   :  { %318 = vmatmul.f32.gmra.mxu1 %v237_v39 }
 0x108   :  { %v185_v45 = vpop.f32.mrf.mxu0 }
 0x109   :  { %v186_v46 = vadd.f32 %v807_v54, %v185_v45 }
 0x10b   :  { %v238_v49 = vmax.f32 %v186_v46, 0.0 }
 0x10d   :  { %321 = vmatmul.f32.gmra.mxu1 %v238_v49 }
 0x110   :  { %v188_v56 = vpop.f32.mrf.mxu0 }
 0x111   :  { %v189_v57 = vadd.f32 %v807_v54, %v188_v56 }
 0x113   :  { %v239_v60 = vmax.f32 %v189_v57, 0.0 }
 0x115   :  { %324 = vmatmul.f32.gmra.mxu1 %v239_v60 }
 0x118   :  { %v191_v1 = vpop.f32.mrf.mxu0 }
 0x119   :  { %v192_v2 = vadd.f32 %v807_v54, %v191_v1 }
 0x11b   :  { %v240_v4 = vmax.f32 %v192_v2, 0.0 }
 0x11d   :  { %327 = vmatmul.f32.gmra.mxu1 %v240_v4 }
 0x120   :  { %v194_v7 = vpop.f32.mrf.mxu0 }
 0x121   :  { %v195_v8 = vadd.f32 %v807_v54, %v194_v7 }
 0x123   :  { %v241_v9 = vmax.f32 %v195_v8, 0.0 }
 0x125   :  { %330 = vmatmul.f32.gmra.mxu1 %v241_v9 }
 0x128   :  { %v197_v10 = vpop.f32.mrf.mxu0 }
 0x129   :  { %v198_v11 = vadd.f32 %v807_v54, %v197_v10 }
 0x12b   :  { %v242_v12 = vmax.f32 %v198_v11, 0.0 }
 0x12d   :  { %333 = vmatmul.f32.gmra.mxu1 %v242_v12 }
 0x130   :  { %v200_v14 = vpop.f32.mrf.mxu0 }
 0x131   :  { %v201_v15 = vadd.f32 %v807_v54, %v200_v14 }
 0x132   :  { %v289_v16 = vpop.f32.mrf.mxu1 }
 0x133   :  { %v243_v17 = vmax.f32 %v201_v15, 0.0  ;;  %v290_v18 = vadd.f32 %v834_v13, %v289_v16 }
 0x135   :  { %v364_v19 = vmax.f32 %v290_v18, 0.0  ;;  %336 = vmatmul.f32.gmra.mxu1 %v243_v17 }
 0x137   :  { %425 = vmatmul.f32.vlgmr.msra.gmra.mxu2 %v364_v19 }
 0x138   :  { %v203_v20 = vpop.f32.mrf.mxu0 }
 0x139   :  { %v204_v21 = vadd.f32 %v807_v54, %v203_v20 }
 0x13a   :  { %v292_v22 = vpop.f32.mrf.mxu1 }
 0x13b   :  { %v244_v23 = vmax.f32 %v204_v21, 0.0  ;;  %v293_v24 = vadd.f32 %v834_v13, %v292_v22 }
 0x13d   :  { %v365_v25 = vmax.f32 %v293_v24, 0.0  ;;  %339 = vmatmul.f32.gmra.mxu1 %v244_v23 }
 0x13e   :  { %v346_v50 = vpop.f32.mrf.mxu3 }
 0x13f   :  { %428 = vmatmul.f32.gmra.mxu2 %v365_v25  ;;  %v347_v52 = vadd.f32 %v834_v13, %v346_v50 }
 0x140   :  { %v206_v26 = vpop.f32.mrf.mxu0 }
 0x141   :  { %v207_v27 = vadd.f32 %v807_v54, %v206_v26  ;;  %v383_v55 = vmax.f32 %v347_v52, 0.0 }
 0x142   :  { %v295_v28 = vpop.f32.mrf.mxu1 }
 0x143   :  { %v245_v29 = vmax.f32 %v207_v27, 0.0  ;;  %v296_v30 = vadd.f32 %v834_v13, %v295_v28  ;;  %482 = vmatmul.f32.vlgmr.msra.gmra.mxu3 %v383_v55 }
 0x145   :  { %v366_v31 = vmax.f32 %v296_v30, 0.0  ;;  %342 = vmatmul.f32.gmra.mxu1 %v245_v29  ;;  %v865_v29 = vld [vmem:[%s906_s6] ss:$0 sm:$0xff]  ;;  %s739_s6 = smov [#allocation10]  }
 0x146   :  { %v349_v57 = vpop.f32.mrf.mxu3  ;;  %s530_s23 = sshll.u32 %s739_s6, 4  ;;  %s531_s23 = int_to_ptr.vmem [resolvable:$true] %s530_s23 }
 0x147   :  { %431 = vmatmul.f32.gmra.mxu2 %v366_v31  ;;  %v350_v59 = vadd.f32 %v834_v13, %v349_v57 }
 0x149   :  { %v384_v61 = vmax.f32 %v350_v59, 0.0 }
 0x14a   :  { %v298_v32 = vpop.f32.mrf.mxu1 }
 0x14b   :  { %v299_v33 = vadd.f32 %v834_v13, %v298_v32  ;;  %485 = vmatmul.f32.gmra.mxu3 %v384_v61 }
 0x14d   :  { %v367_v34 = vmax.f32 %v299_v33, 0.0 }
 0x14e   :  { %v352_v63 = vpop.f32.mrf.mxu3 }
 0x14f   :  { %434 = vmatmul.f32.gmra.mxu2 %v367_v34  ;;  %v353_v1 = vadd.f32 %v834_v13, %v352_v63 }
 0x151   :  { %v385_v3 = vmax.f32 %v353_v1, 0.0 }
 0x152   :  { %v301_v35 = vpop.f32.mrf.mxu1 }
 0x153   :  { %v302_v36 = vadd.f32 %v834_v13, %v301_v35  ;;  %488 = vmatmul.f32.gmra.mxu3 %v385_v3 }
 0x155   :  { %v368_v37 = vmax.f32 %v302_v36, 0.0 }
 0x156   :  { %v355_v5 = vpop.f32.mrf.mxu3 }
 0x157   :  { %437 = vmatmul.f32.gmra.mxu2 %v368_v37  ;;  %v356_v7 = vadd.f32 %v834_v13, %v355_v5 }
 0x159   :  { %v386_v9 = vmax.f32 %v356_v7, 0.0 }
 0x15a   :  { %v304_v38 = vpop.f32.mrf.mxu1 }
 0x15b   :  { %v305_v54 = vadd.f32 %v834_v13, %v304_v38  ;;  %491 = vmatmul.f32.gmra.mxu3 %v386_v9 }
 0x15d   :  { %v369_v39 = vmax.f32 %v305_v54, 0.0 }
 0x15e   :  { %v358_v11 = vpop.f32.mrf.mxu3 }
 0x15f   :  { %440 = vmatmul.f32.gmra.mxu2 %v369_v39  ;;  %v359_v14 = vadd.f32 %v834_v13, %v358_v11 }
 0x161   :  { %v387_v16 = vmax.f32 %v359_v14, 0.0 }
 0x162   :  { %v307_v40 = vpop.f32.mrf.mxu1 }
 0x163   :  { %v308_v41 = vadd.f32 %v834_v13, %v307_v40  ;;  %494 = vmatmul.f32.gmra.mxu3 %v387_v16 }
 0x165   :  { %v370_v42 = vmax.f32 %v308_v41, 0.0 }
 0x166   :  { %v361_v18 = vpop.f32.mrf.mxu3 }
 0x167   :  { %443 = vmatmul.f32.gmra.mxu2 %v370_v42  ;;  %v362_v20 = vadd.f32 %v834_v13, %v361_v18 }
 0x169   :  { %v388_v22 = vmax.f32 %v362_v20, 0.0 }
 0x16a   :  { %v310_v43 = vpop.f32.mrf.mxu1 }
 0x16b   :  { %v311_v44 = vadd.f32 %v834_v13, %v310_v43  ;;  %497 = vmatmul.f32.gmra.mxu3 %v388_v22 }
 0x16d   :  { %v371_v45 = vmax.f32 %v311_v44, 0.0 }
 0x16f   :  { %446 = vmatmul.f32.gmra.mxu2 %v371_v45 }
 0x172   :  { %v313_v46 = vpop.f32.mrf.mxu1 }
 0x173   :  { %v314_v47 = vadd.f32 %v834_v13, %v313_v46 }
 0x175   :  { %v372_v48 = vmax.f32 %v314_v47, 0.0 }
 0x177   :  { %449 = vmatmul.f32.gmra.mxu2 %v372_v48 }
 0x17a   :  { %v316_v49 = vpop.f32.mrf.mxu1 }
 0x17b   :  { %v317_v51 = vadd.f32 %v834_v13, %v316_v49 }
 0x17d   :  { %v373_v53 = vmax.f32 %v317_v51, 0.0 }
 0x17f   :  { %452 = vmatmul.f32.gmra.mxu2 %v373_v53 }
 0x182   :  { %v319_v56 = vpop.f32.mrf.mxu1 }
 0x183   :  { %v320_v58 = vadd.f32 %v834_v13, %v319_v56 }
 0x185   :  { %v374_v60 = vmax.f32 %v320_v58, 0.0 }
 0x187   :  { %455 = vmatmul.f32.gmra.mxu2 %v374_v60 }
 0x18a   :  { %v322_v62 = vpop.f32.mrf.mxu1 }
 0x18b   :  { %v323_v0 = vadd.f32 %v834_v13, %v322_v62 }
 0x18d   :  { %v375_v2 = vmax.f32 %v323_v0, 0.0 }
 0x18f   :  { %458 = vmatmul.f32.gmra.mxu2 %v375_v2 }
 0x192   :  { %v325_v4 = vpop.f32.mrf.mxu1 }
 0x193   :  { %v326_v6 = vadd.f32 %v834_v13, %v325_v4 }
 0x195   :  { %v376_v8 = vmax.f32 %v326_v6, 0.0 }
 0x197   :  { %461 = vmatmul.f32.gmra.mxu2 %v376_v8 }
 0x19a   :  { %v328_v10 = vpop.f32.mrf.mxu1 }
 0x19b   :  { %v329_v12 = vadd.f32 %v834_v13, %v328_v10 }
 0x19d   :  { %v377_v15 = vmax.f32 %v329_v12, 0.0 }
 0x19f   :  { %464 = vmatmul.f32.gmra.mxu2 %v377_v15 }
 0x1a2   :  { %v331_v17 = vpop.f32.mrf.mxu1 }
 0x1a3   :  { %v332_v19 = vadd.f32 %v834_v13, %v331_v17 }
 0x1a5   :  { %v378_v21 = vmax.f32 %v332_v19, 0.0 }
 0x1a7   :  { %467 = vmatmul.f32.gmra.mxu2 %v378_v21 }
 0x1aa   :  { %v334_v23 = vpop.f32.mrf.mxu1 }
 0x1ab   :  { %v335_v24 = vadd.f32 %v834_v13, %v334_v23 }
 0x1ad   :  { %v379_v25 = vmax.f32 %v335_v24, 0.0 }
 0x1af   :  { %470 = vmatmul.f32.gmra.mxu2 %v379_v25 }
 0x1b2   :  { %v337_v26 = vpop.f32.mrf.mxu1 }
 0x1b3   :  { %v338_v27 = vadd.f32 %v834_v13, %v337_v26 }
 0x1b5   :  { %v380_v28 = vmax.f32 %v338_v27, 0.0 }
 0x1b7   :  { %473 = vmatmul.f32.gmra.mxu2 %v380_v28 }
 0x1ba   :  { %v340_v30 = vpop.f32.mrf.mxu1  ;;  %v426_v31 = vpop.f32.mrf.mxu2 }
 0x1bb   :  { %v341_v32 = vadd.f32 %v834_v13, %v340_v30  ;;  %v427_v33 = vadd.f32 %v865_v29, %v426_v31 }
 0x1bd   :  { %v381_v34 = vmax.f32 %v341_v32, 0.0  ;;  %501 = vst [vmem:[#allocation10] sm:$0xff] %v427_v33 }
 0x1bf   :  { %476 = vmatmul.f32.gmra.mxu2 %v381_v34 }
 0x1c2   :  { %v343_v35 = vpop.f32.mrf.mxu1  ;;  %v429_v36 = vpop.f32.mrf.mxu2 }
 0x1c3   :  { %v344_v37 = vadd.f32 %v834_v13, %v343_v35  ;;  %v430_v38 = vadd.f32 %v865_v29, %v429_v36 }
 0x1c5   :  { %v382_v54 = vmax.f32 %v344_v37, 0.0  ;;  %502 = vst [vmem:[#allocation10 + $0x8] sm:$0xff] %v430_v38 }
 0x1c6   :  { %v483_v53 = vpop.f32.mrf.mxu3 }
 0x1c7   :  { %479 = vmatmul.f32.gmra.mxu2 %v382_v54  ;;  %v484_v56 = vadd.f32 %v865_v29, %v483_v53 }
 0x1c9   :  { %520 = vst [vmem:[#allocation10 + $0x98] sm:$0xff] %v484_v56 }
 0x1ca   :  { %v432_v39 = vpop.f32.mrf.mxu2 }
 0x1cb   :  { %v433_v40 = vadd.f32 %v865_v29, %v432_v39 }
 0x1cd   :  { %503 = vst [vmem:[#allocation10 + $0x10] sm:$0xff] %v433_v40 }
 0x1ce   :  { %v486_v58 = vpop.f32.mrf.mxu3 }
 0x1cf   :  { %v487_v60 = vadd.f32 %v865_v29, %v486_v58 }
 0x1d1   :  { %521 = vst [vmem:[#allocation10 + $0xa0] sm:$0xff] %v487_v60 }
 0x1d2   :  { %v435_v41 = vpop.f32.mrf.mxu2 }
 0x1d3   :  { %v436_v42 = vadd.f32 %v865_v29, %v435_v41 }
 0x1d5   :  { %504 = vst [vmem:[#allocation10 + $0x18] sm:$0xff] %v436_v42 }
 0x1d6   :  { %v489_v62 = vpop.f32.mrf.mxu3 }
 0x1d7   :  { %v490_v0 = vadd.f32 %v865_v29, %v489_v62 }
 0x1d9   :  { %522 = vst [vmem:[#allocation10 + $0xa8] sm:$0xff] %v490_v0 }
 0x1da   :  { %v438_v43 = vpop.f32.mrf.mxu2 }
 0x1db   :  { %v439_v44 = vadd.f32 %v865_v29, %v438_v43 }
 0x1dd   :  { %505 = vst [vmem:[#allocation10 + $0x20] sm:$0xff] %v439_v44 }
 0x1de   :  { %v492_v2 = vpop.f32.mrf.mxu3 }
 0x1df   :  { %v493_v4 = vadd.f32 %v865_v29, %v492_v2 }
 0x1e1   :  { %523 = vst [vmem:[#allocation10 + $0xb0] sm:$0xff] %v493_v4 }
 0x1e2   :  { %v441_v45 = vpop.f32.mrf.mxu2 }
 0x1e3   :  { %v442_v13 = vadd.f32 %v865_v29, %v441_v45 }
 0x1e5   :  { %506 = vst [vmem:[#allocation10 + $0x28] sm:$0xff] %v442_v13 }
 0x1e6   :  { %v495_v6 = vpop.f32.mrf.mxu3 }
 0x1e7   :  { %v496_v8 = vadd.f32 %v865_v29, %v495_v6 }
 0x1e9   :  { %524 = vst [vmem:[#allocation10 + $0xb8] sm:$0xff] %v496_v8 }
 0x1ea   :  { %v444_v46 = vpop.f32.mrf.mxu2 }
 0x1eb   :  { %v445_v47 = vadd.f32 %v865_v29, %v444_v46 }
 0x1ed   :  { %507 = vst [vmem:[#allocation10 + $0x30] sm:$0xff] %v445_v47 }
 0x1ee   :  { %v498_v10 = vpop.f32.mrf.mxu3 }
 0x1ef   :  { %v499_v12 = vadd.f32 %v865_v29, %v498_v10 }
 0x1f1   :  { %525 = vst [vmem:[#allocation10 + $0xc0] sm:$0xff] %v499_v12 }
 0x1f2   :  { %v447_v48 = vpop.f32.mrf.mxu2 }
 0x1f3   :  { %v448_v49 = vadd.f32 %v865_v29, %v447_v48 }
 0x1f5   :  { %508 = vst [vmem:[#allocation10 + $0x38] sm:$0xff] %v448_v49 }
 0x1fa   :  { %v450_v50 = vpop.f32.mrf.mxu2 }
 0x1fb   :  { %v451_v51 = vadd.f32 %v865_v29, %v450_v50 }
 0x1fd   :  { %509 = vst [vmem:[#allocation10 + $0x40] sm:$0xff] %v451_v51 }
 0x202   :  { %v453_v52 = vpop.f32.mrf.mxu2 }
 0x203   :  { %v454_v55 = vadd.f32 %v865_v29, %v453_v52 }
 0x205   :  { %510 = vst [vmem:[#allocation10 + $0x48] sm:$0xff] %v454_v55 }
 0x20a   :  { %v456_v57 = vpop.f32.mrf.mxu2 }
 0x20b   :  { %v457_v59 = vadd.f32 %v865_v29, %v456_v57 }
 0x20d   :  { %511 = vst [vmem:[#allocation10 + $0x50] sm:$0xff] %v457_v59 }
 0x212   :  { %v459_v61 = vpop.f32.mrf.mxu2 }
 0x213   :  { %v460_v63 = vadd.f32 %v865_v29, %v459_v61 }
 0x215   :  { %512 = vst [vmem:[#allocation10 + $0x58] sm:$0xff] %v460_v63 }
 0x21a   :  { %v462_v1 = vpop.f32.mrf.mxu2 }
 0x21b   :  { %v463_v3 = vadd.f32 %v865_v29, %v462_v1 }
 0x21d   :  { %513 = vst [vmem:[#allocation10 + $0x60] sm:$0xff] %v463_v3 }
 0x222   :  { %v465_v5 = vpop.f32.mrf.mxu2 }
 0x223   :  { %v466_v7 = vadd.f32 %v865_v29, %v465_v5 }
 0x225   :  { %514 = vst [vmem:[#allocation10 + $0x68] sm:$0xff] %v466_v7 }
 0x22a   :  { %v468_v9 = vpop.f32.mrf.mxu2 }
 0x22b   :  { %v469_v11 = vadd.f32 %v865_v29, %v468_v9 }
 0x22d   :  { %515 = vst [vmem:[#allocation10 + $0x70] sm:$0xff] %v469_v11 }
 0x232   :  { %v471_v14 = vpop.f32.mrf.mxu2 }
 0x233   :  { %v472_v15 = vadd.f32 %v865_v29, %v471_v14 }
 0x235   :  { %516 = vst [vmem:[#allocation10 + $0x78] sm:$0xff] %v472_v15 }
 0x23a   :  { %v474_v16 = vpop.f32.mrf.mxu2 }
 0x23b   :  { %v475_v17 = vadd.f32 %v865_v29, %v474_v16 }
 0x23d   :  { %517 = vst [vmem:[#allocation10 + $0x80] sm:$0xff] %v475_v17 }
 0x242   :  { %v477_v18 = vpop.f32.mrf.mxu2 }
 0x243   :  { %v478_v19 = vadd.f32 %v865_v29, %v477_v18 }
 0x245   :  { %518 = vst [vmem:[#allocation10 + $0x88] sm:$0xff] %v478_v19 }
 0x24a   :  { %v480_v20 = vpop.f32.mrf.mxu2 }
 0x24b   :  { %v481_v21 = vadd.f32 %v865_v29, %v480_v20 }
 0x24d   :  { %519 = vst [vmem:[#allocation10 + $0x90] sm:$0xff] %v481_v21 }
 0x24e   :  { %538 = dma.vmem_to_hbm [thread:$0]  %s531_s23, 3200, %s533_s26, [#allocation4], %s734_s9, %s734_s9, %s735_s10  }
 0x24f   :  { %731 = dma.done.wait [#allocation4], 3200  }
 0x250   :  { %732 = vsyncadd [#allocation4], 4294964096 }
 0x251   :  { %543 = vsyncpa [#allocation3], 1 }
 0x252   :  { %544 = vsyncpa [#allocation6], 1 }
 0x253   :  { %545 = vsyncpa [#allocation9], 1 }
 0x254   :  { %546 = vsyncpa [#allocation4], 1 }

// kernel: tpu_custom_call.1
= control target key start
LH: loop header
LB: loop body
LE: loop exit
PB: predicated region body
PF: predicated region fallthrough
CT: control target
= control target key end

     0   :  { %12 = vsyncpa [#allocation3], 0  ;;  %s900_s0 = inlined_call_operand.hbm [shape: f32[200,128], index: 0, kind: input, shape index: {}]   ;;  %s901_s1 = inlined_call_operand.hbm [shape: f32[128,128], index: 1, kind: input, shape index: {}]   ;;  %s902_s2 = inlined_call_operand.vmem [shape: f32[1,128], index: 2, kind: input, shape index: {}]   ;;  %s903_s3 = inlined_call_operand.hbm [shape: f32[128,128], index: 3, kind: input, shape index: {}]   ;;  %s904_s4 = inlined_call_operand.vmem [shape: f32[1,128], index: 4, kind: input, shape index: {}]   ;;  %s905_s5 = inlined_call_operand.hbm [shape: f32[128,128], index: 5, kind: input, shape index: {}]   ;;  %s906_s6 = inlined_call_operand.vmem [shape: f32[1,128], index: 6, kind: input, shape index: {}]   ;;  %s907_s7 = inlined_call_operand.hbm [shape: f32[200,128], index: 7, kind: output, shape index: {}]  }
   0x1   :  { %13 = vsyncpa [#allocation6], 0 }
   0x2   :  { %14 = vsyncpa [#allocation9], 0 }
   0x3   :  { %15 = vsyncpa [#allocation4], 0  ;;  %s33_s26 = sshll.u32 %s901_s1, 4  ;;  %s733_s27 = smov [#allocation5]   ;;  %s34_s26 = int_to_ptr.hbm [resolvable:$true] %s33_s26 }
   0x4   :  { %s35_s28 = sshll.u32 %s733_s27, 4  ;;  %s20_s8 = sshll.u32 %s900_s0, 4  ;;  %s36_s28 = int_to_ptr.vmem [resolvable:$true] %s35_s28  ;;  %s21_s8 = int_to_ptr.hbm [resolvable:$true] %s20_s8 }
   0x5   :  { %s734_s9 = smov 128   ;;  %s735_s10 = smov 8  }
   0x6   :  { %41 = dma.hbm_to_vmem [thread:$0]  %s34_s26, 2048, %s36_s28, [#allocation6], %s734_s9, %s734_s9, %s735_s10  }
   0x7   :  { %s736_s11 = smov [#allocation2]   ;;  %s48_s1 = sshll.u32 %s903_s3, 4  ;;  %s49_s1 = int_to_ptr.hbm [resolvable:$true] %s48_s1 }
   0x8   :  { %s22_s12 = sshll.u32 %s736_s11, 4  ;;  %s63_s16 = sshll.u32 %s905_s5, 4  ;;  %s23_s12 = int_to_ptr.vmem [resolvable:$true] %s22_s12  ;;  %s64_s16 = int_to_ptr.hbm [resolvable:$true] %s63_s16 }
   0x9   :  { %28 = dma.hbm_to_vmem [thread:$0]  %s21_s8, 3200, %s23_s12, [#allocation3], %s734_s9, %s734_s9, %s735_s10  }
   0xa   :  { %s737_s17 = smov [#allocation7]   ;;  %s738_s19 = smov [#allocation8]  }
   0xb   :  { %s50_s18 = sshll.u32 %s737_s17, 4  ;;  %s65_s3 = sshll.u32 %s738_s19, 4  ;;  %s51_s18 = int_to_ptr.vmem [resolvable:$true] %s50_s18  ;;  %s66_s3 = int_to_ptr.vmem [resolvable:$true] %s65_s3 }
   0xc   :  { %56 = dma.hbm_to_vmem [thread:$0]  %s49_s1, 2048, %s51_s18, [#allocation6], %s734_s9, %s734_s9, %s735_s10  }
   0xd   :  { %71 = dma.hbm_to_vmem [thread:$0]  %s64_s16, 2048, %s66_s3, [#allocation9], %s734_s9, %s734_s9, %s735_s10  }
   0xe   :  { %725 = dma.done.wait [#allocation3], 3200  }
   0xf   :  { %726 = vsyncadd [#allocation3], 4294964096 }
  0x10   :  { %727 = dma.done.wait [#allocation6], 4096  }
  0x11   :  { %728 = vsyncadd [#allocation6], 4294963200 }
  0x12   :  { %729 = dma.done.wait [#allocation9], 2048  }
  0x13   :  { %730 = vsyncadd [#allocation9], 4294965248  ;;  %v130_v0 = vld [vmem:[#allocation5 + $0x78] sm:$0xff]  ;;  %v129_v1 = vld [vmem:[#allocation5 + $0x70] sm:$0xff]  ;;  %s532_s26 = sshll.u32 %s907_s7, 4  ;;  %s533_s26 = int_to_ptr.hbm [resolvable:$true] %s532_s26 }
  0x14   :  { %135 = vmatpush.msra.mxu0 %v130_v0  ;;  %547 = vmatpush.msra.mxu3 %v130_v0  ;;  %v128_v2 = vld [vmem:[#allocation5 + $0x68] sm:$0xff]  ;;  %v127_v3 = vld [vmem:[#allocation5 + $0x60] sm:$0xff]  ;;  %v126_v4 = vld [vmem:[#allocation5 + $0x58] sm:$0xff] }
  0x15   :  { %v125_v5 = vld [vmem:[#allocation5 + $0x50] sm:$0xff]  ;;  %v124_v6 = vld [vmem:[#allocation5 + $0x48] sm:$0xff]  ;;  %v123_v7 = vld [vmem:[#allocation5 + $0x40] sm:$0xff] }
  0x16   :  { %136 = vmatpush.msra.mxu0 %v129_v1  ;;  %548 = vmatpush.msra.mxu3 %v129_v1  ;;  %v122_v8 = vld [vmem:[#allocation5 + $0x38] sm:$0xff]  ;;  %v121_v9 = vld [vmem:[#allocation5 + $0x30] sm:$0xff]  ;;  %v120_v10 = vld [vmem:[#allocation5 + $0x28] sm:$0xff] }
  0x17   :  { %v119_v11 = vld [vmem:[#allocation5 + $0x20] sm:$0xff]  ;;  %v118_v12 = vld [vmem:[#allocation5 + $0x18] sm:$0xff]  ;;  %v117_v13 = vld [vmem:[#allocation5 + $0x10] sm:$0xff] }
  0x18   :  { %137 = vmatpush.msra.mxu0 %v128_v2  ;;  %549 = vmatpush.msra.mxu3 %v128_v2  ;;  %v116_v14 = vld [vmem:[#allocation5 + $0x8] sm:$0xff]  ;;  %v115_v15 = vld [vmem:[#allocation5] sm:$0xff]  ;;  %v90_v16 = vld [vmem:[#allocation2] sm:$0xff] }
  0x19   :  { %v91_v17 = vld [vmem:[#allocation2 + $0x8] sm:$0xff]  ;;  %v92_v18 = vld [vmem:[#allocation2 + $0x10] sm:$0xff]  ;;  %v93_v19 = vld [vmem:[#allocation2 + $0x18] sm:$0xff] }
  0x1a   :  { %138 = vmatpush.msra.mxu0 %v127_v3  ;;  %550 = vmatpush.msra.mxu3 %v127_v3  ;;  %v94_v20 = vld [vmem:[#allocation2 + $0x20] sm:$0xff]  ;;  %v95_v21 = vld [vmem:[#allocation2 + $0x28] sm:$0xff]  ;;  %v96_v22 = vld [vmem:[#allocation2 + $0x30] sm:$0xff] }
  0x1b   :  { %v97_v23 = vld [vmem:[#allocation2 + $0x38] sm:$0xff]  ;;  %v98_v25 = vld [vmem:[#allocation2 + $0x40] sm:$0xff]  ;;  %v265_v29 = vld [vmem:[#allocation7 + $0x68] sm:$0xff] }
  0x1c   :  { %139 = vmatpush.msra.mxu0 %v126_v4  ;;  %551 = vmatpush.msra.mxu3 %v126_v4  ;;  %v109_v24 = vld [vmem:[#allocation2 + $0x98] sm:$0xff]  ;;  %v267_v26 = vld [vmem:[#allocation7 + $0x78] sm:$0xff]  ;;  %v99_v30 = vld [vmem:[#allocation2 + $0x48] sm:$0xff] }
  0x1d   :  { %v110_v27 = vld [vmem:[#allocation2 + $0xa0] sm:$0xff]  ;;  %v266_v28 = vld [vmem:[#allocation7 + $0x70] sm:$0xff]  ;;  %272 = vmatpush.msra.mxu1 %v267_v26  ;;  %v264_v31 = vld [vmem:[#allocation7 + $0x60] sm:$0xff] }
  0x1e   :  { %140 = vmatpush.msra.mxu0 %v125_v5  ;;  %552 = vmatpush.msra.mxu3 %v125_v5  ;;  %v263_v32 = vld [vmem:[#allocation7 + $0x58] sm:$0xff]  ;;  %v111_v33 = vld [vmem:[#allocation2 + $0xa8] sm:$0xff]  ;;  %v262_v34 = vld [vmem:[#allocation7 + $0x50] sm:$0xff] }
  0x1f   :  { %273 = vmatpush.msra.mxu1 %v266_v28  ;;  %v261_v35 = vld [vmem:[#allocation7 + $0x48] sm:$0xff]  ;;  %v260_v37 = vld [vmem:[#allocation7 + $0x40] sm:$0xff]  ;;  %v259_v38 = vld [vmem:[#allocation7 + $0x38] sm:$0xff] }
  0x20   :  { %141 = vmatpush.msra.mxu0 %v124_v6  ;;  %553 = vmatpush.msra.mxu3 %v124_v6  ;;  %v100_v36 = vld [vmem:[#allocation2 + $0x50] sm:$0xff]  ;;  %v258_v40 = vld [vmem:[#allocation7 + $0x30] sm:$0xff]  ;;  %v256_v43 = vld [vmem:[#allocation7 + $0x20] sm:$0xff] }
  0x21   :  { %274 = vmatpush.msra.mxu1 %v265_v29  ;;  %v112_v39 = vld [vmem:[#allocation2 + $0xb0] sm:$0xff]  ;;  %v101_v42 = vld [vmem:[#allocation2 + $0x58] sm:$0xff]  ;;  %v255_v44 = vld [vmem:[#allocation7 + $0x18] sm:$0xff] }
  0x22   :  { %142 = vmatpush.msra.mxu0 %v123_v7  ;;  %554 = vmatpush.msra.mxu3 %v123_v7  ;;  %v257_v41 = vld [vmem:[#allocation7 + $0x28] sm:$0xff]  ;;  %v113_v45 = vld [vmem:[#allocation2 + $0xb8] sm:$0xff]  ;;  %v102_v47 = vld [vmem:[#allocation2 + $0x60] sm:$0xff] }
  0x23   :  { %275 = vmatpush.msra.mxu1 %v264_v31  ;;  %v254_v46 = vld [vmem:[#allocation7 + $0x10] sm:$0xff]  ;;  %v253_v48 = vld [vmem:[#allocation7 + $0x8] sm:$0xff]  ;;  %v252_v49 = vld [vmem:[#allocation7] sm:$0xff] }
  0x24   :  { %143 = vmatpush.msra.mxu0 %v122_v8  ;;  %555 = vmatpush.msra.mxu3 %v122_v8  ;;  %v114_v50 = vld [vmem:[#allocation2 + $0xc0] sm:$0xff]  ;;  %v103_v51 = vld [vmem:[#allocation2 + $0x68] sm:$0xff]  ;;  %v104_v52 = vld [vmem:[#allocation2 + $0x70] sm:$0xff] }
  0x25   :  { %276 = vmatpush.msra.mxu1 %v263_v32  ;;  %v105_v53 = vld [vmem:[#allocation2 + $0x78] sm:$0xff]  ;;  %v807_v54 = vld [vmem:[%s902_s2] ss:$0 sm:$0xff]  ;;  %v107_v60 = vld [vmem:[#allocation2 + $0x88] sm:$0xff] }
  0x26   :  { %144 = vmatpush.msra.mxu0 %v121_v9  ;;  %556 = vmatpush.msra.mxu3 %v121_v9  ;;  %v106_v56 = vld [vmem:[#allocation2 + $0x80] sm:$0xff]  ;;  %v108_v0 = vld [vmem:[#allocation2 + $0x90] sm:$0xff] }
  0x27   :  { %277 = vmatpush.msra.mxu1 %v262_v34 }
  0x28   :  { %145 = vmatpush.msra.mxu0 %v120_v10  ;;  %557 = vmatpush.msra.mxu3 %v120_v10 }
  0x29   :  { %278 = vmatpush.msra.mxu1 %v261_v35 }
  0x2a   :  { %146 = vmatpush.msra.mxu0 %v119_v11  ;;  %558 = vmatpush.msra.mxu3 %v119_v11 }
  0x2b   :  { %279 = vmatpush.msra.mxu1 %v260_v37 }
  0x2c   :  { %147 = vmatpush.msra.mxu0 %v118_v12  ;;  %559 = vmatpush.msra.mxu3 %v118_v12 }
  0x2d   :  { %280 = vmatpush.msra.mxu1 %v259_v38 }
  0x2e   :  { %148 = vmatpush.msra.mxu0 %v117_v13  ;;  %560 = vmatpush.msra.mxu3 %v117_v13 }
  0x2f   :  { %281 = vmatpush.msra.mxu1 %v258_v40 }
  0x30   :  { %149 = vmatpush.msra.mxu0 %v116_v14  ;;  %561 = vmatpush.msra.mxu3 %v116_v14 }
  0x31   :  { %282 = vmatpush.msra.mxu1 %v257_v41 }
  0x32   :  { %150 = vmatpush.msra.mxu0 %v115_v15  ;;  %562 = vmatpush.msra.mxu3 %v115_v15 }
  0x33   :  { %151 = vmatmul.f32.vlgmr.msra.gmra.mxu0 %v90_v16  ;;  %208 = vmatmul.f32.vlgmr.msra.gmra.mxu3 %v109_v24  ;;  %v404_v24 = vld [vmem:[#allocation8 + $0x78] sm:$0xff] }
  0x34   :  { %563 = vmatpush.msrb.mxu3 %v267_v26  ;;  %283 = vmatpush.msra.mxu1 %v256_v43 }
  0x35   :  { %409 = vmatpush.msra.mxu2 %v404_v24 }
  0x36   :  { %564 = vmatpush.msrb.mxu3 %v266_v28  ;;  %284 = vmatpush.msra.mxu1 %v255_v44 }
  0x38   :  { %565 = vmatpush.msrb.mxu3 %v265_v29  ;;  %285 = vmatpush.msra.mxu1 %v254_v46 }
  0x3a   :  { %566 = vmatpush.msrb.mxu3 %v264_v31  ;;  %286 = vmatpush.msra.mxu1 %v253_v48  ;;  %v402_v31 = vld [vmem:[#allocation8 + $0x68] sm:$0xff] }
  0x3b   :  { %154 = vmatmul.f32.gmra.mxu0 %v91_v17  ;;  %211 = vmatmul.f32.gmra.mxu3 %v110_v27  ;;  %v403_v27 = vld [vmem:[#allocation8 + $0x70] sm:$0xff] }
  0x3c   :  { %567 = vmatpush.msrb.mxu3 %v263_v32  ;;  %287 = vmatpush.msra.mxu1 %v252_v49 }
  0x3d   :  { %410 = vmatpush.msra.mxu2 %v403_v27 }
  0x3e   :  { %568 = vmatpush.msrb.mxu3 %v262_v34  ;;  %v400_v34 = vld [vmem:[#allocation8 + $0x58] sm:$0xff] }
  0x3f   :  { %411 = vmatpush.msra.mxu2 %v402_v31 }
  0x40   :  { %569 = vmatpush.msrb.mxu3 %v261_v35 }
  0x42   :  { %570 = vmatpush.msrb.mxu3 %v260_v37  ;;  %v399_v37 = vld [vmem:[#allocation8 + $0x50] sm:$0xff] }
  0x43   :  { %157 = vmatmul.f32.gmra.mxu0 %v92_v18  ;;  %214 = vmatmul.f32.gmra.mxu3 %v111_v33  ;;  %v401_v33 = vld [vmem:[#allocation8 + $0x60] sm:$0xff] }
  0x44   :  { %571 = vmatpush.msrb.mxu3 %v259_v38  ;;  %412 = vmatpush.msra.mxu2 %v401_v33 }
  0x46   :  { %572 = vmatpush.msrb.mxu3 %v258_v40  ;;  %413 = vmatpush.msra.mxu2 %v400_v34 }
  0x48   :  { %573 = vmatpush.msrb.mxu3 %v257_v41  ;;  %414 = vmatpush.msra.mxu2 %v399_v37  ;;  %v398_v41 = vld [vmem:[#allocation8 + $0x48] sm:$0xff] }
  0x4a   :  { %574 = vmatpush.msrb.mxu3 %v256_v43  ;;  %415 = vmatpush.msra.mxu2 %v398_v41  ;;  %v397_v43 = vld [vmem:[#allocation8 + $0x40] sm:$0xff] }
  0x4b   :  { %160 = vmatmul.f32.gmra.mxu0 %v93_v19  ;;  %217 = vmatmul.f32.gmra.mxu3 %v112_v39 }
  0x4c   :  { %575 = vmatpush.msrb.mxu3 %v255_v44  ;;  %416 = vmatpush.msra.mxu2 %v397_v43  ;;  %v396_v44 = vld [vmem:[#allocation8 + $0x38] sm:$0xff] }
  0x4e   :  { %576 = vmatpush.msrb.mxu3 %v254_v46  ;;  %417 = vmatpush.msra.mxu2 %v396_v44 }
  0x50   :  { %577 = vmatpush.msrb.mxu3 %v253_v48 }
  0x52   :  { %578 = vmatpush.msrb.mxu3 %v252_v49 }
  0x53   :  { %163 = vmatmul.f32.gmra.mxu0 %v94_v20  ;;  %220 = vmatmul.f32.gmra.mxu3 %v113_v45 }
  0x54   :  { %579 = vmatpush.msra.mxu3 %v404_v24 }
  0x56   :  { %580 = vmatpush.msra.mxu3 %v403_v27 }
  0x58   :  { %581 = vmatpush.msra.mxu3 %v402_v31 }
  0x5a   :  { %582 = vmatpush.msra.mxu3 %v401_v33 }
  0x5b   :  { %166 = vmatmul.f32.gmra.mxu0 %v95_v21  ;;  %223 = vmatmul.f32.gmra.mxu3 %v114_v50 }
  0x5c   :  { %583 = vmatpush.msra.mxu3 %v400_v34 }
  0x5e   :  { %584 = vmatpush.msra.mxu3 %v399_v37 }
  0x60   :  { %585 = vmatpush.msra.mxu3 %v398_v41 }
  0x62   :  { %586 = vmatpush.msra.mxu3 %v397_v43 }
  0x63   :  { %169 = vmatmul.f32.gmra.mxu0 %v96_v22 }
  0x64   :  { %587 = vmatpush.msra.mxu3 %v396_v44 }
  0x6b   :  { %172 = vmatmul.f32.gmra.mxu0 %v97_v23 }
  0x73   :  { %175 = vmatmul.f32.gmra.mxu0 %v98_v25 }
  0x7b   :  { %178 = vmatmul.f32.gmra.mxu0 %v99_v30 }
  0x83   :  { %181 = vmatmul.f32.gmra.mxu0 %v100_v36 }
  0x8b   :  { %184 = vmatmul.f32.gmra.mxu0 %v101_v42 }
  0x93   :  { %187 = vmatmul.f32.gmra.mxu0 %v102_v47  ;;  %v395_v47 = vld [vmem:[#allocation8 + $0x30] sm:$0xff] }
  0x94   :  { %418 = vmatpush.msra.mxu2 %v395_v47  ;;  %588 = vmatpush.msra.mxu3 %v395_v47 }
  0x9b   :  { %190 = vmatmul.f32.gmra.mxu0 %v103_v51  ;;  %v394_v51 = vld [vmem:[#allocation8 + $0x28] sm:$0xff] }
  0x9c   :  { %419 = vmatpush.msra.mxu2 %v394_v51  ;;  %589 = vmatpush.msra.mxu3 %v394_v51 }
  0xa3   :  { %193 = vmatmul.f32.gmra.mxu0 %v104_v52 }
  0xab   :  { %196 = vmatmul.f32.gmra.mxu0 %v105_v53  ;;  %v393_v53 = vld [vmem:[#allocation8 + $0x20] sm:$0xff] }
  0xac   :  { %420 = vmatpush.msra.mxu2 %v393_v53  ;;  %590 = vmatpush.msra.mxu3 %v393_v53 }
  0xb0   :  { %v152_v55 = vpop.f32.mrf.mxu0 }
  0xb1   :  { %v153_v57 = vadd.f32 %v807_v54, %v152_v55  ;;  %v392_v55 = vld [vmem:[#allocation8 + $0x18] sm:$0xff] }
  0xb2   :  { %421 = vmatpush.msra.mxu2 %v392_v55  ;;  %591 = vmatpush.msra.mxu3 %v392_v55 }
  0xb3   :  { %v227_v58 = vmax.f32 %v153_v57, 0.0  ;;  %199 = vmatmul.f32.gmra.mxu0 %v106_v56 }
  0xb5   :  { %288 = vmatmul.f32.vlgmr.msra.gmra.mxu1 %v227_v58  ;;  %v391_v58 = vld [vmem:[#allocation8 + $0x10] sm:$0xff] }
  0xb6   :  { %v209_v20 = vpop.f32.mrf.mxu3  ;;  %422 = vmatpush.msra.mxu2 %v391_v58  ;;  %592 = vmatpush.msra.mxu3 %v391_v58 }
  0xb7   :  { %v210_v22 = vadd.f32 %v807_v54, %v209_v20 }
  0xb8   :  { %v155_v59 = vpop.f32.mrf.mxu0 }
  0xb9   :  { %v156_v61 = vadd.f32 %v807_v54, %v155_v59  ;;  %v246_v23 = vmax.f32 %v210_v22, 0.0 }
  0xbb   :  { %v228_v62 = vmax.f32 %v156_v61, 0.0  ;;  %202 = vmatmul.f32.gmra.mxu0 %v107_v60  ;;  %345 = vmatmul.f32.vlgmr.msrb.gmra.mxu3 %v246_v23 }
  0xbd   :  { %291 = vmatmul.f32.gmra.mxu1 %v228_v62  ;;  %v390_v62 = vld [vmem:[#allocation8 + $0x8] sm:$0xff] }
  0xbe   :  { %v212_v28 = vpop.f32.mrf.mxu3  ;;  %423 = vmatpush.msra.mxu2 %v390_v62  ;;  %593 = vmatpush.msra.mxu3 %v390_v62 }
  0xbf   :  { %v213_v30 = vadd.f32 %v807_v54, %v212_v28 }
  0xc0   :  { %v158_v63 = vpop.f32.mrf.mxu0 }
  0xc1   :  { %v159_v1 = vadd.f32 %v807_v54, %v158_v63  ;;  %v247_v32 = vmax.f32 %v213_v30, 0.0 }
  0xc3   :  { %v229_v2 = vmax.f32 %v159_v1, 0.0  ;;  %205 = vmatmul.f32.gmra.mxu0 %v108_v0  ;;  %348 = vmatmul.f32.gmra.mxu3 %v247_v32  ;;  %v389_v0 = vld [vmem:[#allocation8] sm:$0xff] }
  0xc4   :  { %424 = vmatpush.msra.mxu2 %v389_v0  ;;  %594 = vmatpush.msra.mxu3 %v389_v0 }
  0xc5   :  { %294 = vmatmul.f32.gmra.mxu1 %v229_v2 }
  0xc6   :  { %v215_v38 = vpop.f32.mrf.mxu3 }
  0xc7   :  { %v216_v40 = vadd.f32 %v807_v54, %v215_v38 }
  0xc8   :  { %v161_v3 = vpop.f32.mrf.mxu0 }
  0xc9   :  { %v162_v4 = vadd.f32 %v807_v54, %v161_v3  ;;  %v248_v42 = vmax.f32 %v216_v40, 0.0 }
  0xcb   :  { %v230_v5 = vmax.f32 %v162_v4, 0.0  ;;  %351 = vmatmul.f32.gmra.mxu3 %v248_v42 }
  0xcd   :  { %297 = vmatmul.f32.gmra.mxu1 %v230_v5 }
  0xce   :  { %v218_v48 = vpop.f32.mrf.mxu3 }
  0xcf   :  { %v219_v50 = vadd.f32 %v807_v54, %v218_v48 }
  0xd0   :  { %v164_v6 = vpop.f32.mrf.mxu0 }
  0xd1   :  { %v165_v7 = vadd.f32 %v807_v54, %v164_v6  ;;  %v249_v52 = vmax.f32 %v219_v50, 0.0 }
  0xd3   :  { %v231_v8 = vmax.f32 %v165_v7, 0.0  ;;  %354 = vmatmul.f32.gmra.mxu3 %v249_v52 }
  0xd5   :  { %300 = vmatmul.f32.gmra.mxu1 %v231_v8 }
  0xd6   :  { %v221_v59 = vpop.f32.mrf.mxu3 }
  0xd7   :  { %v222_v61 = vadd.f32 %v807_v54, %v221_v59 }
  0xd8   :  { %v167_v9 = vpop.f32.mrf.mxu0 }
  0xd9   :  { %v168_v10 = vadd.f32 %v807_v54, %v167_v9  ;;  %v250_v63 = vmax.f32 %v222_v61, 0.0 }
  0xdb   :  { %v232_v11 = vmax.f32 %v168_v10, 0.0  ;;  %357 = vmatmul.f32.gmra.mxu3 %v250_v63 }
  0xdd   :  { %303 = vmatmul.f32.gmra.mxu1 %v232_v11 }
  0xde   :  { %v224_v3 = vpop.f32.mrf.mxu3 }
  0xdf   :  { %v225_v5 = vadd.f32 %v807_v54, %v224_v3 }
  0xe0   :  { %v170_v12 = vpop.f32.mrf.mxu0 }
  0xe1   :  { %v171_v13 = vadd.f32 %v807_v54, %v170_v12  ;;  %v251_v6 = vmax.f32 %v225_v5, 0.0 }
  0xe3   :  { %v233_v14 = vmax.f32 %v171_v13, 0.0  ;;  %360 = vmatmul.f32.gmra.mxu3 %v251_v6  ;;  %v834_v13 = vld [vmem:[%s904_s4] ss:$0 sm:$0xff] }
  0xe5   :  { %306 = vmatmul.f32.gmra.mxu1 %v233_v14 }
  0xe8   :  { %v173_v15 = vpop.f32.mrf.mxu0 }
  0xe9   :  { %v174_v16 = vadd.f32 %v807_v54, %v173_v15 }
  0xeb   :  { %v234_v17 = vmax.f32 %v174_v16, 0.0 }
  0xed   :  { %309 = vmatmul.f32.gmra.mxu1 %v234_v17 }
  0xf0   :  { %v176_v18 = vpop.f32.mrf.mxu0 }
  0xf1   :  { %v177_v19 = vadd.f32 %v807_v54, %v176_v18 }
  0xf3   :  { %v235_v21 = vmax.f32 %v177_v19, 0.0 }
  0xf5   :  { %312 = vmatmul.f32.gmra.mxu1 %v235_v21 }
  0xf8   :  { %v179_v25 = vpop.f32.mrf.mxu0 }
  0xf9   :  { %v180_v26 = vadd.f32 %v807_v54, %v179_v25 }
  0xfb   :  { %v236_v29 = vmax.f32 %v180_v26, 0.0 }
  0xfd   :  { %315 = vmatmul.f32.gmra.mxu1 %v236_v29 }
 0x100   :  { %v182_v35 = vpop.f32.mrf.mxu0 }
 0x101   :  { %v183_v36 = vadd.f32 %v807_v54, %v182_v35 }
 0x103   :  { %v237_v39 = vmax.f32 %v183_v36, 0.0 }
 0x105   :  { %318 = vmatmul.f32.gmra.mxu1 %v237_v39 }
 0x108   :  { %v185_v45 = vpop.f32.mrf.mxu0 }
 0x109   :  { %v186_v46 = vadd.f32 %v807_v54, %v185_v45 }
 0x10b   :  { %v238_v49 = vmax.f32 %v186_v46, 0.0 }
 0x10d   :  { %321 = vmatmul.f32.gmra.mxu1 %v238_v49 }
 0x110   :  { %v188_v56 = vpop.f32.mrf.mxu0 }
 0x111   :  { %v189_v57 = vadd.f32 %v807_v54, %v188_v56 }
 0x113   :  { %v239_v60 = vmax.f32 %v189_v57, 0.0 }
 0x115   :  { %324 = vmatmul.f32.gmra.mxu1 %v239_v60 }
 0x118   :  { %v191_v1 = vpop.f32.mrf.mxu0 }
 0x119   :  { %v192_v2 = vadd.f32 %v807_v54, %v191_v1 }
 0x11b   :  { %v240_v4 = vmax.f32 %v192_v2, 0.0 }
 0x11d   :  { %327 = vmatmul.f32.gmra.mxu1 %v240_v4 }
 0x120   :  { %v194_v7 = vpop.f32.mrf.mxu0 }
 0x121   :  { %v195_v8 = vadd.f32 %v807_v54, %v194_v7 }
 0x123   :  { %v241_v9 = vmax.f32 %v195_v8, 0.0 }
 0x125   :  { %330 = vmatmul.f32.gmra.mxu1 %v241_v9 }
 0x128   :  { %v197_v10 = vpop.f32.mrf.mxu0 }
 0x129   :  { %v198_v11 = vadd.f32 %v807_v54, %v197_v10 }
 0x12b   :  { %v242_v12 = vmax.f32 %v198_v11, 0.0 }
 0x12d   :  { %333 = vmatmul.f32.gmra.mxu1 %v242_v12 }
 0x130   :  { %v200_v14 = vpop.f32.mrf.mxu0 }
 0x131   :  { %v201_v15 = vadd.f32 %v807_v54, %v200_v14 }
 0x132   :  { %v289_v16 = vpop.f32.mrf.mxu1 }
 0x133   :  { %v243_v17 = vmax.f32 %v201_v15, 0.0  ;;  %v290_v18 = vadd.f32 %v834_v13, %v289_v16 }
 0x135   :  { %v364_v19 = vmax.f32 %v290_v18, 0.0  ;;  %336 = vmatmul.f32.gmra.mxu1 %v243_v17 }
 0x137   :  { %425 = vmatmul.f32.vlgmr.msra.gmra.mxu2 %v364_v19 }
 0x138   :  { %v203_v20 = vpop.f32.mrf.mxu0 }
 0x139   :  { %v204_v21 = vadd.f32 %v807_v54, %v203_v20 }
 0x13a   :  { %v292_v22 = vpop.f32.mrf.mxu1 }
 0x13b   :  { %v244_v23 = vmax.f32 %v204_v21, 0.0  ;;  %v293_v24 = vadd.f32 %v834_v13, %v292_v22 }
 0x13d   :  { %v365_v25 = vmax.f32 %v293_v24, 0.0  ;;  %339 = vmatmul.f32.gmra.mxu1 %v244_v23 }
 0x13e   :  { %v346_v50 = vpop.f32.mrf.mxu3 }
 0x13f   :  { %428 = vmatmul.f32.gmra.mxu2 %v365_v25  ;;  %v347_v52 = vadd.f32 %v834_v13, %v346_v50 }
 0x140   :  { %v206_v26 = vpop.f32.mrf.mxu0 }
 0x141   :  { %v207_v27 = vadd.f32 %v807_v54, %v206_v26  ;;  %v383_v55 = vmax.f32 %v347_v52, 0.0 }
 0x142   :  { %v295_v28 = vpop.f32.mrf.mxu1 }
 0x143   :  { %v245_v29 = vmax.f32 %v207_v27, 0.0  ;;  %v296_v30 = vadd.f32 %v834_v13, %v295_v28  ;;  %482 = vmatmul.f32.vlgmr.msra.gmra.mxu3 %v383_v55 }
 0x145   :  { %v366_v31 = vmax.f32 %v296_v30, 0.0  ;;  %342 = vmatmul.f32.gmra.mxu1 %v245_v29  ;;  %v865_v29 = vld [vmem:[%s906_s6] ss:$0 sm:$0xff]  ;;  %s739_s6 = smov [#allocation10]  }
 0x146   :  { %v349_v57 = vpop.f32.mrf.mxu3  ;;  %s530_s23 = sshll.u32 %s739_s6, 4  ;;  %s531_s23 = int_to_ptr.vmem [resolvable:$true] %s530_s23 }
 0x147   :  { %431 = vmatmul.f32.gmra.mxu2 %v366_v31  ;;  %v350_v59 = vadd.f32 %v834_v13, %v349_v57 }
 0x149   :  { %v384_v61 = vmax.f32 %v350_v59, 0.0 }
 0x14a   :  { %v298_v32 = vpop.f32.mrf.mxu1 }
 0x14b   :  { %v299_v33 = vadd.f32 %v834_v13, %v298_v32  ;;  %485 = vmatmul.f32.gmra.mxu3 %v384_v61 }
 0x14d   :  { %v367_v34 = vmax.f32 %v299_v33, 0.0 }
 0x14e   :  { %v352_v63 = vpop.f32.mrf.mxu3 }
 0x14f   :  { %434 = vmatmul.f32.gmra.mxu2 %v367_v34  ;;  %v353_v1 = vadd.f32 %v834_v13, %v352_v63 }
 0x151   :  { %v385_v3 = vmax.f32 %v353_v1, 0.0 }
 0x152   :  { %v301_v35 = vpop.f32.mrf.mxu1 }
 0x153   :  { %v302_v36 = vadd.f32 %v834_v13, %v301_v35  ;;  %488 = vmatmul.f32.gmra.mxu3 %v385_v3 }
 0x155   :  { %v368_v37 = vmax.f32 %v302_v36, 0.0 }
 0x156   :  { %v355_v5 = vpop.f32.mrf.mxu3 }
 0x157   :  { %437 = vmatmul.f32.gmra.mxu2 %v368_v37  ;;  %v356_v7 = vadd.f32 %v834_v13, %v355_v5 }
 0x159   :  { %v386_v9 = vmax.f32 %v356_v7, 0.0 }
 0x15a   :  { %v304_v38 = vpop.f32.mrf.mxu1 }
 0x15b   :  { %v305_v54 = vadd.f32 %v834_v13, %v304_v38  ;;  %491 = vmatmul.f32.gmra.mxu3 %v386_v9 }
 0x15d   :  { %v369_v39 = vmax.f32 %v305_v54, 0.0 }
 0x15e   :  { %v358_v11 = vpop.f32.mrf.mxu3 }
 0x15f   :  { %440 = vmatmul.f32.gmra.mxu2 %v369_v39  ;;  %v359_v14 = vadd.f32 %v834_v13, %v358_v11 }
 0x161   :  { %v387_v16 = vmax.f32 %v359_v14, 0.0 }
 0x162   :  { %v307_v40 = vpop.f32.mrf.mxu1 }
 0x163   :  { %v308_v41 = vadd.f32 %v834_v13, %v307_v40  ;;  %494 = vmatmul.f32.gmra.mxu3 %v387_v16 }
 0x165   :  { %v370_v42 = vmax.f32 %v308_v41, 0.0 }
 0x166   :  { %v361_v18 = vpop.f32.mrf.mxu3 }
 0x167   :  { %443 = vmatmul.f32.gmra.mxu2 %v370_v42  ;;  %v362_v20 = vadd.f32 %v834_v13, %v361_v18 }
 0x169   :  { %v388_v22 = vmax.f32 %v362_v20, 0.0 }
 0x16a   :  { %v310_v43 = vpop.f32.mrf.mxu1 }
 0x16b   :  { %v311_v44 = vadd.f32 %v834_v13, %v310_v43  ;;  %497 = vmatmul.f32.gmra.mxu3 %v388_v22 }
 0x16d   :  { %v371_v45 = vmax.f32 %v311_v44, 0.0 }
 0x16f   :  { %446 = vmatmul.f32.gmra.mxu2 %v371_v45 }
 0x172   :  { %v313_v46 = vpop.f32.mrf.mxu1 }
 0x173   :  { %v314_v47 = vadd.f32 %v834_v13, %v313_v46 }
 0x175   :  { %v372_v48 = vmax.f32 %v314_v47, 0.0 }
 0x177   :  { %449 = vmatmul.f32.gmra.mxu2 %v372_v48 }
 0x17a   :  { %v316_v49 = vpop.f32.mrf.mxu1 }
 0x17b   :  { %v317_v51 = vadd.f32 %v834_v13, %v316_v49 }
 0x17d   :  { %v373_v53 = vmax.f32 %v317_v51, 0.0 }
 0x17f   :  { %452 = vmatmul.f32.gmra.mxu2 %v373_v53 }
 0x182   :  { %v319_v56 = vpop.f32.mrf.mxu1 }
 0x183   :  { %v320_v58 = vadd.f32 %v834_v13, %v319_v56 }
 0x185   :  { %v374_v60 = vmax.f32 %v320_v58, 0.0 }
 0x187   :  { %455 = vmatmul.f32.gmra.mxu2 %v374_v60 }
 0x18a   :  { %v322_v62 = vpop.f32.mrf.mxu1 }
 0x18b   :  { %v323_v0 = vadd.f32 %v834_v13, %v322_v62 }
 0x18d   :  { %v375_v2 = vmax.f32 %v323_v0, 0.0 }
 0x18f   :  { %458 = vmatmul.f32.gmra.mxu2 %v375_v2 }
 0x192   :  { %v325_v4 = vpop.f32.mrf.mxu1 }
 0x193   :  { %v326_v6 = vadd.f32 %v834_v13, %v325_v4 }
 0x195   :  { %v376_v8 = vmax.f32 %v326_v6, 0.0 }
 0x197   :  { %461 = vmatmul.f32.gmra.mxu2 %v376_v8 }
 0x19a   :  { %v328_v10 = vpop.f32.mrf.mxu1 }
 0x19b   :  { %v329_v12 = vadd.f32 %v834_v13, %v328_v10 }
 0x19d   :  { %v377_v15 = vmax.f32 %v329_v12, 0.0 }
 0x19f   :  { %464 = vmatmul.f32.gmra.mxu2 %v377_v15 }
 0x1a2   :  { %v331_v17 = vpop.f32.mrf.mxu1 }
 0x1a3   :  { %v332_v19 = vadd.f32 %v834_v13, %v331_v17 }
 0x1a5   :  { %v378_v21 = vmax.f32 %v332_v19, 0.0 }
 0x1a7   :  { %467 = vmatmul.f32.gmra.mxu2 %v378_v21 }
 0x1aa   :  { %v334_v23 = vpop.f32.mrf.mxu1 }
 0x1ab   :  { %v335_v24 = vadd.f32 %v834_v13, %v334_v23 }
 0x1ad   :  { %v379_v25 = vmax.f32 %v335_v24, 0.0 }
 0x1af   :  { %470 = vmatmul.f32.gmra.mxu2 %v379_v25 }
 0x1b2   :  { %v337_v26 = vpop.f32.mrf.mxu1 }
 0x1b3   :  { %v338_v27 = vadd.f32 %v834_v13, %v337_v26 }
 0x1b5   :  { %v380_v28 = vmax.f32 %v338_v27, 0.0 }
 0x1b7   :  { %473 = vmatmul.f32.gmra.mxu2 %v380_v28 }
 0x1ba   :  { %v340_v30 = vpop.f32.mrf.mxu1  ;;  %v426_v31 = vpop.f32.mrf.mxu2 }
 0x1bb   :  { %v341_v32 = vadd.f32 %v834_v13, %v340_v30  ;;  %v427_v33 = vadd.f32 %v865_v29, %v426_v31 }
 0x1bd   :  { %v381_v34 = vmax.f32 %v341_v32, 0.0  ;;  %501 = vst [vmem:[#allocation10] sm:$0xff] %v427_v33 }
 0x1bf   :  { %476 = vmatmul.f32.gmra.mxu2 %v381_v34 }
 0x1c2   :  { %v343_v35 = vpop.f32.mrf.mxu1  ;;  %v429_v36 = vpop.f32.mrf.mxu2 }
 0x1c3   :  { %v344_v37 = vadd.f32 %v834_v13, %v343_v35  ;;  %v430_v38 = vadd.f32 %v865_v29, %v429_v36 }
 0x1c5   :  { %v382_v54 = vmax.f32 %v344_v37, 0.0  ;;  %502 = vst [vmem:[#allocation10 + $0x8] sm:$0xff] %v430_v38 }
 0x1c6   :  { %v483_v53 = vpop.f32.mrf.mxu3 }
 0x1c7   :  { %479 = vmatmul.f32.gmra.mxu2 %v382_v54  ;;  %v484_v56 = vadd.f32 %v865_v29, %v483_v53 }
 0x1c9   :  { %520 = vst [vmem:[#allocation10 + $0x98] sm:$0xff] %v484_v56 }
 0x1ca   :  { %v432_v39 = vpop.f32.mrf.mxu2 }
 0x1cb   :  { %v433_v40 = vadd.f32 %v865_v29, %v432_v39 }
 0x1cd   :  { %503 = vst [vmem:[#allocation10 + $0x10] sm:$0xff] %v433_v40 }
 0x1ce   :  { %v486_v58 = vpop.f32.mrf.mxu3 }
 0x1cf   :  { %v487_v60 = vadd.f32 %v865_v29, %v486_v58 }
 0x1d1   :  { %521 = vst [vmem:[#allocation10 + $0xa0] sm:$0xff] %v487_v60 }
 0x1d2   :  { %v435_v41 = vpop.f32.mrf.mxu2 }
 0x1d3   :  { %v436_v42 = vadd.f32 %v865_v29, %v435_v41 }
 0x1d5   :  { %504 = vst [vmem:[#allocation10 + $0x18] sm:$0xff] %v436_v42 }
 0x1d6   :  { %v489_v62 = vpop.f32.mrf.mxu3 }
 0x1d7   :  { %v490_v0 = vadd.f32 %v865_v29, %v489_v62 }
 0x1d9   :  { %522 = vst [vmem:[#allocation10 + $0xa8] sm:$0xff] %v490_v0 }
 0x1da   :  { %v438_v43 = vpop.f32.mrf.mxu2 }
 0x1db   :  { %v439_v44 = vadd.f32 %v865_v29, %v438_v43 }
 0x1dd   :  { %505 = vst [vmem:[#allocation10 + $0x20] sm:$0xff] %v439_v44 }
 0x1de   :  { %v492_v2 = vpop.f32.mrf.mxu3 }
 0x1df   :  { %v493_v4 = vadd.f32 %v865_v29, %v492_v2 }
 0x1e1   :  { %523 = vst [vmem:[#allocation10 + $0xb0] sm:$0xff] %v493_v4 }
 0x1e2   :  { %v441_v45 = vpop.f32.mrf.mxu2 }
 0x1e3   :  { %v442_v13 = vadd.f32 %v865_v29, %v441_v45 }
 0x1e5   :  { %506 = vst [vmem:[#allocation10 + $0x28] sm:$0xff] %v442_v13 }
 0x1e6   :  { %v495_v6 = vpop.f32.mrf.mxu3 }
 0x1e7   :  { %v496_v8 = vadd.f32 %v865_v29, %v495_v6 }
 0x1e9   :  { %524 = vst [vmem:[#allocation10 + $0xb8] sm:$0xff] %v496_v8 }
 0x1ea   :  { %v444_v46 = vpop.f32.mrf.mxu2 }
 0x1eb   :  { %v445_v47 = vadd.f32 %v865_v29, %v444_v46 }
 0x1ed   :  { %507 = vst [vmem:[#allocation10 + $0x30] sm:$0xff] %v445_v47 }
 0x1ee   :  { %v498_v10 = vpop.f32.mrf.mxu3 }
 0x1ef   :  { %v499_v12 = vadd.f32 %v865_v29, %v498_v10 }
 0x1f1   :  { %525 = vst [vmem:[#allocation10 + $0xc0] sm:$0xff] %v499_v12 }
 0x1f2   :  { %v447_v48 = vpop.f32.mrf.mxu2 }
 0x1f3   :  { %v448_v49 = vadd.f32 %v865_v29, %v447_v48 }
 0x1f5   :  { %508 = vst [vmem:[#allocation10 + $0x38] sm:$0xff] %v448_v49 }
 0x1fa   :  { %v450_v50 = vpop.f32.mrf.mxu2 }
 0x1fb   :  { %v451_v51 = vadd.f32 %v865_v29, %v450_v50 }
 0x1fd   :  { %509 = vst [vmem:[#allocation10 + $0x40] sm:$0xff] %v451_v51 }
 0x202   :  { %v453_v52 = vpop.f32.mrf.mxu2 }
 0x203   :  { %v454_v55 = vadd.f32 %v865_v29, %v453_v52 }
 0x205   :  { %510 = vst [vmem:[#allocation10 + $0x48] sm:$0xff] %v454_v55 }
 0x20a   :  { %v456_v57 = vpop.f32.mrf.mxu2 }
 0x20b   :  { %v457_v59 = vadd.f32 %v865_v29, %v456_v57 }
 0x20d   :  { %511 = vst [vmem:[#allocation10 + $0x50] sm:$0xff] %v457_v59 }
 0x212   :  { %v459_v61 = vpop.f32.mrf.mxu2 }
 0x213   :  { %v460_v63 = vadd.f32 %v865_v29, %v459_v61 }
 0x215   :  { %512 = vst [vmem:[#allocation10 + $0x58] sm:$0xff] %v460_v63 }
 0x21a   :  { %v462_v1 = vpop.f32.mrf.mxu2 }
 0x21b   :  { %v463_v3 = vadd.f32 %v865_v29, %v462_v1 }
 0x21d   :  { %513 = vst [vmem:[#allocation10 + $0x60] sm:$0xff] %v463_v3 }
 0x222   :  { %v465_v5 = vpop.f32.mrf.mxu2 }
 0x223   :  { %v466_v7 = vadd.f32 %v865_v29, %v465_v5 }
 0x225   :  { %514 = vst [vmem:[#allocation10 + $0x68] sm:$0xff] %v466_v7 }
 0x22a   :  { %v468_v9 = vpop.f32.mrf.mxu2 }
 0x22b   :  { %v469_v11 = vadd.f32 %v865_v29, %v468_v9 }
 0x22d   :  { %515 = vst [vmem:[#allocation10 + $0x70] sm:$0xff] %v469_v11 }
 0x232   :  { %v471_v14 = vpop.f32.mrf.mxu2 }
 0x233   :  { %v472_v15 = vadd.f32 %v865_v29, %v471_v14 }
 0x235   :  { %516 = vst [vmem:[#allocation10 + $0x78] sm:$0xff] %v472_v15 }
 0x23a   :  { %v474_v16 = vpop.f32.mrf.mxu2 }
 0x23b   :  { %v475_v17 = vadd.f32 %v865_v29, %v474_v16 }
 0x23d   :  { %517 = vst [vmem:[#allocation10 + $0x80] sm:$0xff] %v475_v17 }
 0x242   :  { %v477_v18 = vpop.f32.mrf.mxu2 }
 0x243   :  { %v478_v19 = vadd.f32 %v865_v29, %v477_v18 }
 0x245   :  { %518 = vst [vmem:[#allocation10 + $0x88] sm:$0xff] %v478_v19 }
 0x24a   :  { %v480_v20 = vpop.f32.mrf.mxu2 }
 0x24b   :  { %v481_v21 = vadd.f32 %v865_v29, %v480_v20 }
 0x24d   :  { %519 = vst [vmem:[#allocation10 + $0x90] sm:$0xff] %v481_v21 }
 0x24e   :  { %538 = dma.vmem_to_hbm [thread:$0]  %s531_s23, 3200, %s533_s26, [#allocation4], %s734_s9, %s734_s9, %s735_s10  }
 0x24f   :  { %731 = dma.done.wait [#allocation4], 3200  }
 0x250   :  { %732 = vsyncadd [#allocation4], 4294964096 }
 0x251   :  { %543 = vsyncpa [#allocation3], 1 }
 0x252   :  { %544 = vsyncpa [#allocation6], 1 }
 0x253   :  { %545 = vsyncpa [#allocation9], 1 }
 0x254   :  { %546 = vsyncpa [#allocation4], 1 }

</bundles_post_ra>
